<compile_context>
chip_gen: v7x
topology: tpu7x:2x2x1
jax: 0.10.0
libtpu: 0.0.40
codegen_flags: <defaults>
</compile_context>

<pallas_src>
import functools

import jax
import jax.numpy as jnp
from jax.experimental import pallas as pl
from jax.experimental.pallas import tpu as pltpu

_IN_FEATURES = 300
_H1 = 512
_H2 = 1024


def _round_up(x, m):
    return ((x + m - 1) // m) * m


def _choose_tm(batch):
    # Small/medium batches: one block exactly the batch size (block dim == full
    # array dim is always legal; zero wasted rows, zero wrapper-side padding).
    if batch <= 256:
        return batch
    # Large batches: 256-row multiples (fills the 256-wide MXU on v6e/v7x and
    # gives >= 2 grid steps for v7x's two TensorCores), capped at 512 so the
    # working set fits comfortably in v5e's scoped VMEM.
    return min(512, _round_up(pl.cdiv(batch, 2), 256))


def _mlp_kernel(x_ref, w1_ref, b1_ref, w2_ref, b2_ref, w3_ref, b3_ref,
                logits_ref, prob_ref, pred_ref, *, num_classes):
    # x block: (tm, 300) f32 -> bf16 at the MXU input; accumulate in f32.
    x = x_ref[...].astype(jnp.bfloat16)

    # Linear(300 -> 512) + ReLU; cast to bf16 immediately (short f32 live range).
    h1 = jnp.dot(x, w1_ref[...], preferred_element_type=jnp.float32)
    h1 = jnp.maximum(h1 + b1_ref[...], 0.0).astype(jnp.bfloat16)

    # Linear(512 -> 1024) + ReLU.
    h2 = jnp.dot(h1, w2_ref[...], preferred_element_type=jnp.float32)
    h2 = jnp.maximum(h2 + b2_ref[...], 0.0).astype(jnp.bfloat16)

    # Linear(1024 -> C_pad).
    logits = jnp.dot(h2, w3_ref[...], preferred_element_type=jnp.float32)
    logits = logits + b3_ref[...]
    logits_ref[...] = logits  # padded class columns sliced off in the wrapper

    # Mask padded class columns (Python literal => no captured trace constant).
    col = jax.lax.broadcasted_iota(jnp.int32, logits.shape, 1)
    masked = jnp.where(col < num_classes, logits, -1e30)

    # Numerically stable softmax over dim 1; exact reciprocal (off the MXU path).
    m = jnp.max(masked, axis=1, keepdims=True)
    e = jnp.exp(masked - m)                     # padded columns underflow to 0
    s = jnp.sum(e, axis=1, keepdims=True)
    prob_ref[...] = e * pl.reciprocal(s, approx=False)

    # argmax over dim 1, first occurrence of the max (matches torch.argmax).
    cand = jnp.where(masked == m, col, jnp.iinfo(jnp.int32).max)
    pred_ref[...] = jnp.min(cand, axis=1)[None, :]   # lane-dense (1, tm) store


def face_classifier1_mlp(x, params, num_classes):
    """x: (B, ...) flattening to (B, 300). Returns (logits, prob, y_pred)."""
    B = x.shape[0]
    x2d = x.reshape(B, -1)
    if x2d.dtype != jnp.float32:
        x2d = x2d.astype(jnp.float32)
    K = x2d.shape[1]
    assert K == _IN_FEATURES, f"expected flattened feature dim {_IN_FEATURES}, got {K}"

    w1, b1, w2, b2, w3, b3 = params

    tm = _choose_tm(B)
    num_blocks = pl.cdiv(B, tm)
    C_pad = _round_up(num_classes, 128)  # lane-dense logits / prob stores

    # One-time (small) weight prep: bf16 weights, lane-padded class dim.
    w1_b = w1.astype(jnp.bfloat16)
    w2_b = w2.astype(jnp.bfloat16)
    w3_b = jnp.pad(w3, ((0, 0), (0, C_pad - num_classes))).astype(jnp.bfloat16)
    b1_f = b1.astype(jnp.float32).reshape(1, _H1)
    b2_f = b2.astype(jnp.float32).reshape(1, _H2)
    b3_f = jnp.pad(b3.astype(jnp.float32), (0, C_pad - num_classes)).reshape(1, C_pad)

    const_map = lambda i: (0, 0)   # weights/biases stay VMEM-resident
    resident = pl.Buffered(1)      # constant blocks: no second pipeline buffer

    grid_spec = pltpu.PrefetchScalarGridSpec(
        num_scalar_prefetch=0,
        grid=(num_blocks,),
        in_specs=[
            pl.BlockSpec((tm, K), lambda i: (i, 0)),          # x: streamed over batch
            pl.BlockSpec((K, _H1), const_map, pipeline_mode=resident),     # w1
            pl.BlockSpec((1, _H1), const_map, pipeline_mode=resident),     # b1
            pl.BlockSpec((_H1, _H2), const_map, pipeline_mode=resident),   # w2
            pl.BlockSpec((1, _H2), const_map, pipeline_mode=resident),     # b2
            pl.BlockSpec((_H2, C_pad), const_map, pipeline_mode=resident), # w3
            pl.BlockSpec((1, C_pad), const_map, pipeline_mode=resident),   # b3
        ],
        out_specs=[
            pl.BlockSpec((tm, C_pad), lambda i: (i, 0)),      # logits
            pl.BlockSpec((tm, C_pad), lambda i: (i, 0)),      # prob
            pl.BlockSpec((1, tm), lambda i: (0, i)),          # argmax (lane-dense)
        ],
    )

    out_shapes = (
        jax.ShapeDtypeStruct((B, C_pad), jnp.float32),
        jax.ShapeDtypeStruct((B, C_pad), jnp.float32),
        jax.ShapeDtypeStruct((1, num_blocks * tm), jnp.int32),
    )

    flops = 2 * B * (K * _H1 + _H1 * _H2 + _H2 * C_pad)
    bytes_accessed = (
        x2d.size * 4
        + (w1_b.size + w2_b.size + w3_b.size) * 2
        + (b1_f.size + b2_f.size + b3_f.size) * 4
        + 2 * B * C_pad * 4
        + num_blocks * tm * 4
    )
    cost = pl.CostEstimate(flops=flops,
                           transcendentals=B * (C_pad + 1),
                           bytes_accessed=bytes_accessed)

    logits_p, prob_p, pred_p = pl.pallas_call(
        functools.partial(_mlp_kernel, num_classes=num_classes),
        out_shape=out_shapes,
        grid_spec=grid_spec,
        compiler_params=pltpu.CompilerParams(
            dimension_semantics=("parallel",),
            vmem_limit_bytes=32 << 20,   # headroom over v5e's 16 MiB scoped default
        ),
        cost_estimate=cost,
    )(x2d, w1_b, b1_f, w2_b, b2_f, w3_b, b3_f)

    logits = logits_p[:, :num_classes]
    prob = prob_p[:, :num_classes]
    y_pred = pred_p.reshape(-1)[:B]
    return logits, prob, y_pred


def init_params(key, num_classes):
    """Deterministic init matching the Linear layer shapes (stored as (in, out))."""
    k1, k2, k3, k4, k5, k6 = jax.random.split(key, 6)

    def lin(kw, kb, fan_in, fan_out):
        bound = 1.0 / jnp.sqrt(fan_in)
        w = jax.random.uniform(kw, (fan_in, fan_out), jnp.float32, -bound, bound)
        b = jax.random.uniform(kb, (fan_out,), jnp.float32, -bound, bound)
        return w, b

    w1, b1 = lin(k1, k2, _IN_FEATURES, _H1)
    w2, b2 = lin(k3, k4, _H1, _H2)
    w3, b3 = lin(k5, k6, _H2, num_classes)
    return (w1, b1, w2, b2, w3, b3)


if __name__ == "__main__":
    num_classes = 10
    batch = 8

    key = jax.random.PRNGKey(0)
    kx, kp = jax.random.split(key)
    # Input flattens to 300 features per sample (e.g. 100 3-D landmarks).
    x = jax.random.normal(kx, (batch, 100, 3), dtype=jnp.float32)
    params = init_params(kp, num_classes)

    logits, prob, y_pred = face_classifier1_mlp(x, params, num_classes)
    jax.block_until_ready((logits, prob, y_pred))

    # Reference mirroring the kernel's bf16-weight / f32-accumulation math.
    w1, b1, w2, b2, w3, b3 = params
    xf = x.reshape(batch, -1)
    h1 = jnp.maximum(
        jnp.dot(xf.astype(jnp.bfloat16), w1.astype(jnp.bfloat16),
                preferred_element_type=jnp.float32) + b1, 0.0)
    h2 = jnp.maximum(
        jnp.dot(h1.astype(jnp.bfloat16), w2.astype(jnp.bfloat16),
                preferred_element_type=jnp.float32) + b2, 0.0)
    logits_ref = jnp.dot(h2.astype(jnp.bfloat16), w3.astype(jnp.bfloat16),
                         preferred_element_type=jnp.float32) + b3

    assert logits.shape == (batch, num_classes)
    assert prob.shape == (batch, num_classes)
    assert y_pred.shape == (batch,)
    # Matmul path correct (bf16 weights => moderate tolerance).
    assert jnp.allclose(logits, logits_ref, atol=2e-2, rtol=2e-2)
    # Softmax / argmax consistent with the kernel's own logits.
    prob_chk = jax.nn.softmax(logits, axis=1)
    assert jnp.allclose(prob, prob_chk, atol=1e-4, rtol=1e-4)
    assert jnp.allclose(jnp.sum(prob, axis=1), 1.0, atol=1e-3)
    assert jnp.all(y_pred == jnp.argmax(logits, axis=1))

    print("KERNEL_OK")
</pallas_src>

<mosaic_0001>
module attributes {stable_mosaic.version = 11 : i64} {
  func.func @_mlp_kernel(%arg0: i32, %arg1: memref<8x300xf32, #tpu.memory_space<vmem>>, %arg2: memref<300x512xbf16, #tpu.memory_space<vmem>>, %arg3: memref<1x512xf32, #tpu.memory_space<vmem>>, %arg4: memref<512x1024xbf16, #tpu.memory_space<vmem>>, %arg5: memref<1x1024xf32, #tpu.memory_space<vmem>>, %arg6: memref<1024x128xbf16, #tpu.memory_space<vmem>>, %arg7: memref<1x128xf32, #tpu.memory_space<vmem>>, %arg8: memref<8x128xf32, #tpu.memory_space<vmem>>, %arg9: memref<8x128xf32, #tpu.memory_space<vmem>>, %arg10: memref<1x8xi32, #tpu.memory_space<vmem>>) attributes {dimension_semantics = [#tpu.dimension_semantics<parallel>], iteration_bounds = array<i64: 1>, scalar_prefetch = 0 : i64, scratch_operands = 0 : i64, tpu.core_type = #tpu.core_type<tc>, window_params = [{transform_indices = @transform_0, window_bounds = array<i64: 8, 300>}, {pipeline_mode = #tpu.pipeline_mode<synchronous>, transform_indices = @transform_1, window_bounds = array<i64: 300, 512>}, {pipeline_mode = #tpu.pipeline_mode<synchronous>, transform_indices = @transform_2, window_bounds = array<i64: 1, 512>}, {pipeline_mode = #tpu.pipeline_mode<synchronous>, transform_indices = @transform_3, window_bounds = array<i64: 512, 1024>}, {pipeline_mode = #tpu.pipeline_mode<synchronous>, transform_indices = @transform_4, window_bounds = array<i64: 1, 1024>}, {pipeline_mode = #tpu.pipeline_mode<synchronous>, transform_indices = @transform_5, window_bounds = array<i64: 1024, 128>}, {pipeline_mode = #tpu.pipeline_mode<synchronous>, transform_indices = @transform_6, window_bounds = array<i64: 1, 128>}, {transform_indices = @transform_7, window_bounds = array<i64: 8, 128>}, {transform_indices = @transform_8, window_bounds = array<i64: 8, 128>}, {transform_indices = @transform_9, window_bounds = array<i64: 1, 8>}]} {
    %c0 = arith.constant 0 : index
    %c0_0 = arith.constant 0 : index
    %0 = vector.load %arg1[%c0, %c0_0] : memref<8x300xf32, #tpu.memory_space<vmem>>, vector<8x300xf32>
    %1 = arith.truncf %0 : vector<8x300xf32> to vector<8x300xbf16>
    %c0_1 = arith.constant 0 : index
    %c0_2 = arith.constant 0 : index
    %2 = vector.load %arg2[%c0_1, %c0_2] : memref<300x512xbf16, #tpu.memory_space<vmem>>, vector<300x512xbf16>
    %cst = arith.constant dense<0.000000e+00> : vector<8x512xf32>
    %3 = tpu.matmul %1, %2, %cst {dimension_numbers = #tpu.dot_dimension_numbers<[1], [0], [0], [1], [0, 0, 1, 1], [], []>} : vector<8x300xbf16>, vector<300x512xbf16>, vector<8x512xf32> -> vector<8x512xf32>
    %c0_3 = arith.constant 0 : index
    %c0_4 = arith.constant 0 : index
    %4 = vector.load %arg3[%c0_3, %c0_4] : memref<1x512xf32, #tpu.memory_space<vmem>>, vector<1x512xf32>
    %5 = vector.broadcast %4 : vector<1x512xf32> to vector<8x512xf32>
    %6 = arith.addf %3, %5 : vector<8x512xf32>
    %cst_5 = arith.constant 0.000000e+00 : f32
    %7 = vector.broadcast %cst_5 : f32 to vector<8x512xf32>
    %8 = arith.maximumf %6, %7 : vector<8x512xf32>
    %9 = arith.truncf %8 : vector<8x512xf32> to vector<8x512xbf16>
    %c0_6 = arith.constant 0 : index
    %c0_7 = arith.constant 0 : index
    %10 = vector.load %arg4[%c0_6, %c0_7] : memref<512x1024xbf16, #tpu.memory_space<vmem>>, vector<512x1024xbf16>
    %cst_8 = arith.constant dense<0.000000e+00> : vector<8x1024xf32>
    %11 = tpu.matmul %9, %10, %cst_8 {dimension_numbers = #tpu.dot_dimension_numbers<[1], [0], [0], [1], [0, 0, 1, 1], [], []>} : vector<8x512xbf16>, vector<512x1024xbf16>, vector<8x1024xf32> -> vector<8x1024xf32>
    %c0_9 = arith.constant 0 : index
    %c0_10 = arith.constant 0 : index
    %12 = vector.load %arg5[%c0_9, %c0_10] : memref<1x1024xf32, #tpu.memory_space<vmem>>, vector<1x1024xf32>
    %13 = vector.broadcast %12 : vector<1x1024xf32> to vector<8x1024xf32>
    %14 = arith.addf %11, %13 : vector<8x1024xf32>
    %cst_11 = arith.constant 0.000000e+00 : f32
    %15 = vector.broadcast %cst_11 : f32 to vector<8x1024xf32>
    %16 = arith.maximumf %14, %15 : vector<8x1024xf32>
    %17 = arith.truncf %16 : vector<8x1024xf32> to vector<8x1024xbf16>
    %c0_12 = arith.constant 0 : index
    %c0_13 = arith.constant 0 : index
    %18 = vector.load %arg6[%c0_12, %c0_13] : memref<1024x128xbf16, #tpu.memory_space<vmem>>, vector<1024x128xbf16>
    %cst_14 = arith.constant dense<0.000000e+00> : vector<8x128xf32>
    %19 = tpu.matmul %17, %18, %cst_14 {dimension_numbers = #tpu.dot_dimension_numbers<[1], [0], [0], [1], [0, 0, 1, 1], [], []>} : vector<8x1024xbf16>, vector<1024x128xbf16>, vector<8x128xf32> -> vector<8x128xf32>
    %c0_15 = arith.constant 0 : index
    %c0_16 = arith.constant 0 : index
    %20 = vector.load %arg7[%c0_15, %c0_16] : memref<1x128xf32, #tpu.memory_space<vmem>>, vector<1x128xf32>
    %21 = vector.broadcast %20 : vector<1x128xf32> to vector<8x128xf32>
    %22 = arith.addf %19, %21 : vector<8x128xf32>
    %c0_17 = arith.constant 0 : index
    %c0_18 = arith.constant 0 : index
    %23 = vector.load %arg8[%c0_17, %c0_18] : memref<8x128xf32, #tpu.memory_space<vmem>>, vector<8x128xf32>
    tpu.vector_store %arg8[%c0_17, %c0_18], %22 {strides = array<i32>} : memref<8x128xf32, #tpu.memory_space<vmem>>, vector<8x128xf32>,
    %24 = tpu.iota {dimensions = array<i32: 1>} : vector<8x128xi32>
    %c10_i32 = arith.constant 10 : i32
    %25 = vector.broadcast %c10_i32 : i32 to vector<8x128xi32>
    %26 = arith.cmpi slt, %24, %25 : vector<8x128xi32>
    %cst_19 = arith.constant -1.000000e+30 : f32
    %27 = vector.broadcast %cst_19 : f32 to vector<8x128xf32>
    %28 = arith.select %26, %22, %27 : vector<8x128xi1>, vector<8x128xf32>
    %cst_20 = arith.constant dense<0xFF800000> : vector<8xf32>
    %29 = vector.multi_reduction <maximumf>, %28, %cst_20 [1] : vector<8x128xf32> to vector<8xf32>
    %30 = vector.shape_cast %29 : vector<8xf32> to vector<8x1xf32>
    %31 = vector.broadcast %30 : vector<8x1xf32> to vector<8x128xf32>
    %32 = arith.subf %28, %31 : vector<8x128xf32>
    %33 = math.exp %32 : vector<8x128xf32>
    %cst_21 = arith.constant dense<0.000000e+00> : vector<8xf32>
    %34 = vector.multi_reduction <add>, %33, %cst_21 [1] : vector<8x128xf32> to vector<8xf32>
    %35 = vector.shape_cast %34 : vector<8xf32> to vector<8x1xf32>
    %36 = tpu.reciprocal %35 : vector<8x1xf32> -> vector<8x1xf32>
    %37 = vector.broadcast %36 : vector<8x1xf32> to vector<8x128xf32>
    %38 = arith.mulf %33, %37 : vector<8x128xf32>
    %c0_22 = arith.constant 0 : index
    %c0_23 = arith.constant 0 : index
    %39 = vector.load %arg9[%c0_22, %c0_23] : memref<8x128xf32, #tpu.memory_space<vmem>>, vector<8x128xf32>
    tpu.vector_store %arg9[%c0_22, %c0_23], %38 {strides = array<i32>} : memref<8x128xf32, #tpu.memory_space<vmem>>, vector<8x128xf32>,
    %40 = vector.broadcast %30 : vector<8x1xf32> to vector<8x128xf32>
    %41 = arith.cmpf oeq, %28, %40 : vector<8x128xf32>
    %c2147483647_i32 = arith.constant 2147483647 : i32
    %42 = vector.broadcast %c2147483647_i32 : i32 to vector<8x128xi32>
    %43 = arith.select %41, %24, %42 : vector<8x128xi1>, vector<8x128xi32>
    %cst_24 = arith.constant dense<2147483647> : vector<8xi32>
    %44 = vector.multi_reduction <minsi>, %43, %cst_24 [1] : vector<8x128xi32> to vector<8xi32>
    %45 = vector.shape_cast %44 : vector<8xi32> to vector<1x8xi32>
    %c0_25 = arith.constant 0 : index
    %c0_26 = arith.constant 0 : index
    %46 = vector.load %arg10[%c0_25, %c0_26] : memref<1x8xi32, #tpu.memory_space<vmem>>, vector<1x8xi32>
    tpu.vector_store %arg10[%c0_25, %c0_26], %45 {strides = array<i32>} : memref<1x8xi32, #tpu.memory_space<vmem>>, vector<1x8xi32>,
    return
  }
  func.func @transform_0(%arg0: i32) -> (i32, i32) {
    %c0_i32 = arith.constant 0 : i32
    %c0_i32_0 = arith.constant 0 : i32
    return %arg0, %c0_i32 : i32, i32
  }
  func.func @transform_1(%arg0: i32) -> (i32, i32) {
    %c0_i32 = arith.constant 0 : i32
    %c0_i32_0 = arith.constant 0 : i32
    %c0_i32_1 = arith.constant 0 : i32
    return %c0_i32, %c0_i32_0 : i32, i32
  }
  func.func @transform_2(%arg0: i32) -> (i32, i32) {
    %c0_i32 = arith.constant 0 : i32
    %c0_i32_0 = arith.constant 0 : i32
    %c0_i32_1 = arith.constant 0 : i32
    return %c0_i32, %c0_i32_0 : i32, i32
  }
  func.func @transform_3(%arg0: i32) -> (i32, i32) {
    %c0_i32 = arith.constant 0 : i32
    %c0_i32_0 = arith.constant 0 : i32
    %c0_i32_1 = arith.constant 0 : i32
    return %c0_i32, %c0_i32_0 : i32, i32
  }
  func.func @transform_4(%arg0: i32) -> (i32, i32) {
    %c0_i32 = arith.constant 0 : i32
    %c0_i32_0 = arith.constant 0 : i32
    %c0_i32_1 = arith.constant 0 : i32
    return %c0_i32, %c0_i32_0 : i32, i32
  }
  func.func @transform_5(%arg0: i32) -> (i32, i32) {
    %c0_i32 = arith.constant 0 : i32
    %c0_i32_0 = arith.constant 0 : i32
    %c0_i32_1 = arith.constant 0 : i32
    return %c0_i32, %c0_i32_0 : i32, i32
  }
  func.func @transform_6(%arg0: i32) -> (i32, i32) {
    %c0_i32 = arith.constant 0 : i32
    %c0_i32_0 = arith.constant 0 : i32
    %c0_i32_1 = arith.constant 0 : i32
    return %c0_i32, %c0_i32_0 : i32, i32
  }
  func.func @transform_7(%arg0: i32) -> (i32, i32) {
    %c0_i32 = arith.constant 0 : i32
    %c0_i32_0 = arith.constant 0 : i32
    return %arg0, %c0_i32 : i32, i32
  }
  func.func @transform_8(%arg0: i32) -> (i32, i32) {
    %c0_i32 = arith.constant 0 : i32
    %c0_i32_0 = arith.constant 0 : i32
    return %arg0, %c0_i32 : i32, i32
  }
  func.func @transform_9(%arg0: i32) -> (i32, i32) {
    %c0_i32 = arith.constant 0 : i32
    %c0_i32_0 = arith.constant 0 : i32
    return %c0_i32, %arg0 : i32, i32
  }
}

</mosaic_0001>

<bundles_post_ra>
// kernel: tpu_custom_call.1
= control target key start
LH: loop header
LB: loop body
LE: loop exit
PB: predicated region body
PF: predicated region fallthrough
CT: control target
= control target key end

     0   :  { %15 = vsyncpa [#allocation3], 0  ;;  %s4572_s0 = inlined_call_operand.hbm [shape: f32[8,300], index: 0, kind: input, shape index: {}]   ;;  %s4573_s1 = inlined_call_operand.hbm [shape: bf16[300,512], index: 1, kind: input, shape index: {}]   ;;  %s4574_s2 = inlined_call_operand.vmem [shape: f32[1,512], index: 2, kind: input, shape index: {}]   ;;  %s4575_s3 = inlined_call_operand.hbm [shape: bf16[512,1024], index: 3, kind: input, shape index: {}]   ;;  %s4576_s4 = inlined_call_operand.vmem [shape: f32[1,1024], index: 4, kind: input, shape index: {}]   ;;  %s4577_s5 = inlined_call_operand.hbm [shape: bf16[1024,128], index: 5, kind: input, shape index: {}]   ;;  %s4578_s6 = inlined_call_operand.vmem [shape: f32[1,128], index: 6, kind: input, shape index: {}]   ;;  %s4579_s7 = inlined_call_operand.hbm [shape: f32[8,128], index: 7, kind: output, shape index: {0}]   ;;  %s4580_s8 = inlined_call_operand.hbm [shape: f32[8,128], index: 8, kind: output, shape index: {1}]   ;;  %s4581_s9 = inlined_call_operand.hbm [shape: s32[1,8], index: 9, kind: output, shape index: {2}]  }
   0x1   :  { %16 = vsyncpa [#allocation6], 0 }
   0x2   :  { %17 = vsyncpa [#allocation9], 0 }
   0x3   :  { %18 = vsyncpa [#allocation4], 0 }
   0x4   :  { %19 = vsyncpa [#allocation12], 0  ;;  %s4321_s30 = smov [#allocation5]   ;;  %s4157_s13 = scalar_lea.hbm %s4573_s1, 9728 }
   0x5   :  { %s35_s10 = sshll.u32 %s4321_s30, 4  ;;  %p4158_p0 = scmp.ne.s32.totalorder %s4573_s1, %s4157_s13  ;;  %s36_s10 = int_to_ptr.vmem [resolvable:$true] %s35_s10 }
   0x6   :  { %p4161_p1 = scmp.lt.u32.totalorder %s4157_s13, %s4573_s1 }
   0x8   :  { %p4163_p2 = pnand %p4161_p1, %p4158_p0 }
   0xa   :  { %4166 = shalt.err (!%p4163_p2)
}
   0xb   :  { %s4167_s18 = scalar_lea.vmem %s36_s10, 9728  ;;  %p4172_p4 = scmp.lt.s32.totalorder %s36_s10, %s36_s10 }
   0xc   :  { %p4168_p3 = scmp.ne.s32.totalorder %s36_s10, %s4167_s18  ;;  %p4173_p5 = scmp.lt.s32.totalorder %s4167_s18, %s4167_s18 }
   0xe   :  { %p4174_p6 = por %p4173_p5, %p4172_p4 }
  0x10   :  { %p4175_p7 = pnand %p4174_p6, %p4168_p3 }
  0x12   :  { %4178 = shalt.err (!%p4175_p7)
}
  0x13   :  { %s4322_s19 = smov 256   ;;  %s4323_s20 = smov 16  }
  0x14   :  { %41 = dma.hbm_to_vmem [thread:$0]  %s4573_s1, 9728, %s36_s10, [#allocation6], %s4322_s19, %s4322_s19, %s4323_s20  }
  0x15   :  { %s4324_s23 = smov [#allocation2]   ;;  %s4325_s25 = smov [#allocation7]  }
  0x16   :  { %s26_s24 = sshll.u32 %s4324_s23, 4  ;;  %s49_s26 = sshll.u32 %s4325_s25, 4  ;;  %s27_s24 = int_to_ptr.vmem [resolvable:$true] %s26_s24  ;;  %s50_s26 = int_to_ptr.vmem [resolvable:$true] %s49_s26 }
  0x17   :  { %s4179_s29 = scalar_lea.hbm %s4572_s0, 384 }
  0x18   :  { %p4180_p8 = scmp.ne.s32.totalorder %s4572_s0, %s4179_s29  ;;  %p4183_p9 = scmp.lt.u32.totalorder %s4179_s29, %s4572_s0 }
  0x1a   :  { %p4185_p10 = pnand %p4183_p9, %p4180_p8 }
  0x1c   :  { %4188 = shalt.err (!%p4185_p10)
}
  0x1d   :  { %s4189_s1 = scalar_lea.vmem %s27_s24, 384  ;;  %p4194_p12 = scmp.lt.s32.totalorder %s27_s24, %s27_s24 }
  0x1e   :  { %p4190_p11 = scmp.ne.s32.totalorder %s27_s24, %s4189_s1  ;;  %p4195_p13 = scmp.lt.s32.totalorder %s4189_s1, %s4189_s1 }
  0x20   :  { %p4196_p0 = por %p4195_p13, %p4194_p12 }
  0x22   :  { %p4197_p1 = pnand %p4196_p0, %p4190_p11 }
  0x24   :  { %4200 = shalt.err (!%p4197_p1)
}
  0x25   :  { %29 = dma.hbm_to_vmem [thread:$0]  %s4572_s0, 384, %s27_s24, [#allocation3]  }
  0x26   :  { %s4201_s17 = scalar_lea.hbm %s4575_s3, 32768 }
  0x27   :  { %p4202_p2 = scmp.ne.s32.totalorder %s4575_s3, %s4201_s17  ;;  %p4205_p3 = scmp.lt.u32.totalorder %s4201_s17, %s4575_s3 }
  0x29   :  { %p4207_p4 = pnand %p4205_p3, %p4202_p2 }
  0x2b   :  { %4210 = shalt.err (!%p4207_p4)
}
  0x2c   :  { %s4211_s22 = scalar_lea.vmem %s50_s26, 32768  ;;  %p4216_p6 = scmp.lt.s32.totalorder %s50_s26, %s50_s26 }
  0x2d   :  { %p4212_p5 = scmp.ne.s32.totalorder %s50_s26, %s4211_s22  ;;  %p4217_p7 = scmp.lt.s32.totalorder %s4211_s22, %s4211_s22 }
  0x2f   :  { %p4218_p8 = por %p4217_p7, %p4216_p6 }
  0x31   :  { %p4219_p9 = pnand %p4218_p8, %p4212_p5 }
  0x33   :  { %4222 = shalt.err (!%p4219_p9)
}
  0x34   :  { %s4326_s0 = smov 512   ;;  %s4327_s23 = smov 32  }
  0x35   :  { %55 = dma.hbm_to_vmem [thread:$0]  %s4575_s3, 32768, %s50_s26, [#allocation6], %s4326_s0, %s4326_s0, %s4327_s23  }
  0x36   :  { %s4328_s27 = smov [#allocation8]   ;;  %s4223_s11 = scalar_lea.hbm %s4577_s5, 8192 }
  0x37   :  { %s63_s28 = sshll.u32 %s4328_s27, 4  ;;  %p4224_p10 = scmp.ne.s32.totalorder %s4577_s5, %s4223_s11  ;;  %s64_s28 = int_to_ptr.vmem [resolvable:$true] %s63_s28 }
  0x38   :  { %p4227_p11 = scmp.lt.u32.totalorder %s4223_s11, %s4577_s5 }
  0x3a   :  { %p4229_p12 = pnand %p4227_p11, %p4224_p10 }
  0x3c   :  { %4232 = shalt.err (!%p4229_p12)
}
  0x3d   :  { %s4233_s14 = scalar_lea.vmem %s64_s28, 8192  ;;  %p4238_p0 = scmp.lt.s32.totalorder %s64_s28, %s64_s28 }
  0x3e   :  { %p4234_p13 = scmp.ne.s32.totalorder %s64_s28, %s4233_s14  ;;  %p4239_p1 = scmp.lt.s32.totalorder %s4233_s14, %s4233_s14 }
  0x40   :  { %p4240_p2 = por %p4239_p1, %p4238_p0 }
  0x42   :  { %p4241_p3 = pnand %p4240_p2, %p4234_p13 }
  0x44   :  { %4244 = shalt.err (!%p4241_p3)
}
  0x45   :  { %s4329_s3 = smov 64   ;;  %s4330_s26 = smov 4  }
  0x46   :  { %69 = dma.hbm_to_vmem [thread:$0]  %s4577_s5, 8192, %s64_s28, [#allocation9], %s4329_s3, %s4329_s3, %s4330_s26  }
  0x47   :  { %4311 = dma.done.wait [#allocation3], 384  }
  0x48   :  { %4312 = vsyncadd [#allocation3], 4294966912 }
  0x49   :  { %4313 = dma.done.wait [#allocation6], 42496  }
  0x4a   :  { %4314 = vsyncadd [#allocation6], 4294924800 }
  0x4b   :  { %4315 = dma.done.wait [#allocation9], 8192  }
  0x4c   :  { %4316 = vsyncadd [#allocation9], 4294959104  ;;  %v3975_v0 = vld [vmem:[#allocation5 + $0x4] ss:$16 sps:$4 sm:$0xff]   ;;  %v3977_v1 = vld [vmem:[#allocation5] ss:$16 sps:$4 sm:$0xff]  }
  0x4d   :  { %582 = vmatprep.subr.bf16.mxu0 %v3975_v0  ;;  %v3978_v2 = vld [vmem:[#allocation5 + $0x24] ss:$16 sps:$4 sm:$0xff]   ;;  %v3980_v3 = vld [vmem:[#allocation5 + $0x20] ss:$16 sps:$4 sm:$0xff]   ;;  %v4014_v11 = vld [vmem:[#allocation5 + $0xc] ss:$16 sps:$4 sm:$0xff]  }
  0x4e   :  { %583 = vmatpush1.bf16.msra.mxu0 %v3977_v1  ;;  %v3981_v4 = vld [vmem:[#allocation5 + $0x44] ss:$16 sps:$4 sm:$0xff]   ;;  %v3983_v5 = vld [vmem:[#allocation5 + $0x40] ss:$16 sps:$4 sm:$0xff]   ;;  %v4016_v12 = vld [vmem:[#allocation5 + $0x8] ss:$16 sps:$4 sm:$0xff]   ;;  %664 = vmatprep.subr.bf16.mxu1 %v4014_v11 }
  0x4f   :  { %584 = vmatprep.subr.bf16.mxu0 %v3978_v2  ;;  %v3984_v6 = vld [vmem:[#allocation5 + $0x64] ss:$16 sps:$4 sm:$0xff]   ;;  %v3986_v7 = vld [vmem:[#allocation5 + $0x60] ss:$16 sps:$4 sm:$0xff]   ;;  %v4020_v15 = vld [vmem:[#allocation5 + $0x2c] ss:$16 sps:$4 sm:$0xff]   ;;  %665 = vmatpush1.bf16.msra.mxu1 %v4016_v12 }
  0x50   :  { %v3987_v8 = vld [vmem:[#allocation5 + $0x84] ss:$16 sps:$4 sm:$0xff]   ;;  %v3989_v9 = vld [vmem:[#allocation5 + $0x80] ss:$16 sps:$4 sm:$0xff]   ;;  %v4022_v16 = vld [vmem:[#allocation5 + $0x28] ss:$16 sps:$4 sm:$0xff]   ;;  %666 = vmatprep.subr.bf16.mxu1 %v4020_v15 }
  0x51   :  { %v3990_v10 = vld [vmem:[#allocation5 + $0xa4] ss:$16 sps:$4 sm:$0xff]   ;;  %v3992_v13 = vld [vmem:[#allocation5 + $0xa0] ss:$16 sps:$4 sm:$0xff]   ;;  %v4026_v18 = vld [vmem:[#allocation5 + $0x4c] ss:$16 sps:$4 sm:$0xff]  }
  0x52   :  { %585 = vmatpush1.bf16.msra.mxu0 %v3980_v3  ;;  %v3993_v14 = vld [vmem:[#allocation5 + $0xc4] ss:$16 sps:$4 sm:$0xff]   ;;  %v3995_v17 = vld [vmem:[#allocation5 + $0xc0] ss:$16 sps:$4 sm:$0xff]   ;;  %v4028_v20 = vld [vmem:[#allocation5 + $0x48] ss:$16 sps:$4 sm:$0xff]  }
  0x53   :  { %586 = vmatprep.subr.bf16.mxu0 %v3981_v4  ;;  %v3996_v19 = vld [vmem:[#allocation5 + $0xe4] ss:$16 sps:$4 sm:$0xff]   ;;  %667 = vmatpush1.bf16.msra.mxu1 %v4022_v16  ;;  %v4032_v21 = vld [vmem:[#allocation5 + $0x6c] ss:$16 sps:$4 sm:$0xff]   ;;  %v3998_v23 = vld [vmem:[#allocation5 + $0xe0] ss:$16 sps:$4 sm:$0xff]  }
  0x54   :  { %668 = vmatprep.subr.bf16.mxu1 %v4026_v18  ;;  %v86_v22 = vld [vmem:[#allocation2 + $0x8] sm:$0xff]  ;;  %v4034_v26 = vld [vmem:[#allocation5 + $0x68] ss:$16 sps:$4 sm:$0xff]   ;;  %v4038_v27 = vld [vmem:[#allocation5 + $0x8c] ss:$16 sps:$4 sm:$0xff]   ;;  %vm569_vm0 = vcmask 1045504  }
  0x55   :  { %v89_v24 = vpack.c.bf16 %v86_v22, %v86_v22  ;;  %v3999_v25 = vld [vmem:[#allocation5 + $0x104] ss:$16 sps:$4 sm:$0xff]   ;;  %v4001_v28 = vld [vmem:[#allocation5 + $0x100] ss:$16 sps:$4 sm:$0xff]   ;;  %v4040_v30 = vld [vmem:[#allocation5 + $0x88] ss:$16 sps:$4 sm:$0xff]  }
  0x56   :  { %587 = vmatpush1.bf16.msra.mxu0 %v3983_v5  ;;  %v4002_v29 = vld [vmem:[#allocation5 + $0x124] ss:$16 sps:$4 sm:$0xff]   ;;  %v4044_v31 = vld [vmem:[#allocation5 + $0xac] ss:$16 sps:$4 sm:$0xff]   ;;  %v4004_v32 = vld [vmem:[#allocation5 + $0x120] ss:$16 sps:$4 sm:$0xff]  }
  0x57   :  { %588 = vmatprep.subr.bf16.mxu0 %v3984_v6  ;;  %669 = vmatpush1.bf16.msra.mxu1 %v4028_v20  ;;  %v4005_v33 = vld [vmem:[#allocation5 + $0x144] ss:$16 sps:$4 sm:$0xff]   ;;  %v4046_v34 = vld [vmem:[#allocation5 + $0xa8] ss:$16 sps:$4 sm:$0xff]   ;;  %v4050_v35 = vld [vmem:[#allocation5 + $0xcc] ss:$16 sps:$4 sm:$0xff]  }
  0x58   :  { %614 = vmatprep.mubr.bf16.mxu0 %v89_v24  ;;  %670 = vmatprep.subr.bf16.mxu1 %v4032_v21  ;;  %v4007_v36 = vld [vmem:[#allocation5 + $0x140] ss:$16 sps:$4 sm:$0xff]   ;;  %v4008_v37 = vld [vmem:[#allocation5 + $0x164] ss:$16 sps:$4 sm:$0xff]   ;;  %v4052_v38 = vld [vmem:[#allocation5 + $0xc8] ss:$16 sps:$4 sm:$0xff]  }
  0x59   :  { %696 = vmatprep.mubr.bf16.mxu1 %v89_v24  ;;  %v4053_v39 = vld [vmem:[#allocation5 + $0xec] ss:$16 sps:$4 sm:$0xff]   ;;  %v4010_v40 = vld [vmem:[#allocation5 + $0x160] ss:$16 sps:$4 sm:$0xff]   ;;  %v4011_v41 = vld [vmem:[#allocation5 + $0x184] ss:$16 sps:$4 sm:$0xff]  }
  0x5a   :  { %589 = vmatpush1.bf16.msra.mxu0 %v3986_v7  ;;  %v4055_v42 = vld [vmem:[#allocation5 + $0xe8] ss:$16 sps:$4 sm:$0xff]   ;;  %v4056_v43 = vld [vmem:[#allocation5 + $0x10c] ss:$16 sps:$4 sm:$0xff]   ;;  %v4013_v44 = vld [vmem:[#allocation5 + $0x180] ss:$16 sps:$4 sm:$0xff]  }
  0x5b   :  { %590 = vmatprep.subr.bf16.mxu0 %v3987_v8  ;;  %671 = vmatpush1.bf16.msra.mxu1 %v4034_v26  ;;  %v4017_v45 = vld [vmem:[#allocation5 + $0x1a4] ss:$16 sps:$4 sm:$0xff]   ;;  %v4058_v46 = vld [vmem:[#allocation5 + $0x108] ss:$16 sps:$4 sm:$0xff]   ;;  %v4059_v47 = vld [vmem:[#allocation5 + $0x12c] ss:$16 sps:$4 sm:$0xff]  }
  0x5c   :  { %672 = vmatprep.subr.bf16.mxu1 %v4038_v27  ;;  %v4019_v48 = vld [vmem:[#allocation5 + $0x1a0] ss:$16 sps:$4 sm:$0xff]   ;;  %v4023_v49 = vld [vmem:[#allocation5 + $0x1c4] ss:$16 sps:$4 sm:$0xff]   ;;  %v4061_v50 = vld [vmem:[#allocation5 + $0x128] ss:$16 sps:$4 sm:$0xff]  }
  0x5d   :  { %v4062_v51 = vld [vmem:[#allocation5 + $0x14c] ss:$16 sps:$4 sm:$0xff]   ;;  %v4025_v52 = vld [vmem:[#allocation5 + $0x1c0] ss:$16 sps:$4 sm:$0xff]   ;;  %v4029_v53 = vld [vmem:[#allocation5 + $0x1e4] ss:$16 sps:$4 sm:$0xff]  }
  0x5e   :  { %591 = vmatpush1.bf16.msra.mxu0 %v3989_v9  ;;  %v4064_v54 = vld [vmem:[#allocation5 + $0x148] ss:$16 sps:$4 sm:$0xff]   ;;  %v4065_v55 = vld [vmem:[#allocation5 + $0x16c] ss:$16 sps:$4 sm:$0xff]   ;;  %v4031_v56 = vld [vmem:[#allocation5 + $0x1e0] ss:$16 sps:$4 sm:$0xff]  }
  0x5f   :  { %592 = vmatprep.subr.bf16.mxu0 %v3990_v10  ;;  %673 = vmatpush1.bf16.msra.mxu1 %v4040_v30  ;;  %v85_v57 = vld [vmem:[#allocation2] sm:$0xff]  ;;  %v4037_v58 = vld [vmem:[#allocation5 + $0x204] ss:$16 sps:$4 sm:$0xff]   ;;  %v4035_v62 = vld [vmem:[#allocation5 + $0x200] ss:$16 sps:$4 sm:$0xff]   ;;  %v4331_v5 = vmov 0  }
  0x60   :  { %674 = vmatprep.subr.bf16.mxu1 %v4044_v31  ;;  %v4067_v59 = vld [vmem:[#allocation5 + $0x168] ss:$16 sps:$4 sm:$0xff]   ;;  %v4433_v60 = vpack.c.bf16 %v85_v57, %v85_v57  ;;  %v4068_v61 = vld [vmem:[#allocation5 + $0x18c] ss:$16 sps:$4 sm:$0xff]   ;;  %v4043_v63 = vld [vmem:[#allocation5 + $0x224] ss:$16 sps:$4 sm:$0xff]  }
  0x61   :  { %v4049_v0 = vld [vmem:[#allocation5 + $0x240] ss:$16 sps:$4 sm:$0x3f]   ;;  %v4070_v1 = vld [vmem:[#allocation5 + $0x188] ss:$16 sps:$4 sm:$0xff]   ;;  %vm565_vm1 = vcmask 359424  }
  0x62   :  { %593 = vmatpush1.bf16.msra.mxu0 %v3992_v13  ;;  %v4071_v2 = vld [vmem:[#allocation5 + $0x1ac] ss:$16 sps:$4 sm:$0xff]   ;;  %v4088_v3 = vld [vmem:[#allocation5 + $0x248] ss:$16 sps:$4 sm:$0x3f]   ;;  %v754_v8 = vld [vmem:[#allocation7] sm:$0xff] }
  0x63   :  { %594 = vmatprep.subr.bf16.mxu0 %v3993_v14  ;;  %675 = vmatpush1.bf16.msra.mxu1 %v4046_v34  ;;  %v4041_v4 = vld [vmem:[#allocation5 + $0x220] ss:$16 sps:$4 sm:$0xff]   ;;  %v4047_v6 = vld [vmem:[#allocation5 + $0x244] ss:$16 sps:$4 sm:$0x3f]   ;;  %v571_v10 = vsel %vm569_vm0, %v4049_v0, 0 }
  0x64   :  { %676 = vmatprep.subr.bf16.mxu1 %v4050_v35  ;;  %v4073_v7 = vld [vmem:[#allocation5 + $0x1a8] ss:$16 sps:$4 sm:$0xff]   ;;  %v758_v9 = vld [vmem:[#allocation7 + $0x20] sm:$0xff]  ;;  %v4074_v12 = vld [vmem:[#allocation5 + $0x1cc] ss:$16 sps:$4 sm:$0xff]   ;;  %v4438_v13 = vsel %vm569_vm0, %v4088_v3, 0 }
  0x65   :  { %v87_v11 = vld [vmem:[#allocation2 + $0x10] sm:$0xff]  ;;  %v762_v15 = vld [vmem:[#allocation7 + $0x40] sm:$0xff]  ;;  %v3517_v18 = vcombine.high %v754_v8, %v758_v9  ;;  %v3516_v21 = vcombine.low %v754_v8, %v758_v9  ;;  %s4333_s21 = smov [#allocation10]  }
  0x66   :  { %595 = vmatpush1.bf16.msra.mxu0 %v3995_v17  ;;  %v4076_v14 = vld [vmem:[#allocation5 + $0x1c8] ss:$16 sps:$4 sm:$0xff]   ;;  %v766_v16 = vld [vmem:[#allocation7 + $0x60] sm:$0xff]  ;;  %v4077_v17 = vld [vmem:[#allocation5 + $0x1ec] ss:$16 sps:$4 sm:$0xff]   ;;  %s3398_s22 = sshll.u32 %s4333_s21, 4  ;;  %s3399_s22 = int_to_ptr.vmem [resolvable:$true] %s3398_s22 }
  0x67   :  { %596 = vmatprep.subr.bf16.mxu0 %v3996_v19  ;;  %677 = vmatpush1.bf16.msra.mxu1 %v4052_v38  ;;  %v4441_v19 = vpack.c.bf16 %v87_v11, %v87_v11  ;;  %v4079_v20 = vld [vmem:[#allocation5 + $0x1e8] ss:$16 sps:$4 sm:$0xff]   ;;  %v770_v22 = vld [vmem:[#allocation7 + $0x80] sm:$0xff]  ;;  %v4082_v24 = vld [vmem:[#allocation5 + $0x20c] ss:$16 sps:$4 sm:$0xff]   ;;  %v3524_v27 = vcombine.low %v762_v15, %v766_v16 }
  0x68   :  { %678 = vmatprep.subr.bf16.mxu1 %v4053_v39  ;;  %v4080_v26 = vld [vmem:[#allocation5 + $0x208] ss:$16 sps:$4 sm:$0xff]   ;;  %v4085_v30 = vld [vmem:[#allocation5 + $0x22c] ss:$16 sps:$4 sm:$0xff]   ;;  %v786_v34 = vld [vmem:[#allocation7 + $0x100] sm:$0xff] }
  0x69   :  { %v790_v35 = vld [vmem:[#allocation7 + $0x120] sm:$0xff]  ;;  %v755_v38 = vld [vmem:[#allocation7 + $0x8] sm:$0xff] }
  0x6a   :  { %597 = vmatpush1.bf16.msra.mxu0 %v3998_v23  ;;  %v774_v23 = vld [vmem:[#allocation7 + $0xa0] sm:$0xff]  ;;  %v759_v39 = vld [vmem:[#allocation7 + $0x28] sm:$0xff] }
  0x6b   :  { %598 = vmatprep.subr.bf16.mxu0 %v3999_v25  ;;  %679 = vmatpush1.bf16.msra.mxu1 %v4055_v42  ;;  %v3525_v25 = vcombine.high %v762_v15, %v766_v16  ;;  %v3533_v31 = vcombine.high %v770_v22, %v774_v23  ;;  %v798_v42 = vld [vmem:[#allocation7 + $0x160] sm:$0xff] }
  0x6c   :  { %680 = vmatprep.subr.bf16.mxu1 %v4056_v43  ;;  %v3549_v43 = vcombine.high %v786_v34, %v790_v35  ;;  %v814_v57 = vld [vmem:[#allocation7 + $0x1e0] sm:$0xff] }
  0x6d   :  { %v818_v0 = vld [vmem:[#allocation7 + $0x200] sm:$0xff] }
  0x6e   :  { %599 = vmatpush1.bf16.msra.mxu0 %v4001_v28  ;;  %v778_v28 = vld [vmem:[#allocation7 + $0xc0] sm:$0xff] }
  0x6f   :  { %600 = vmatprep.subr.bf16.mxu0 %v4002_v29  ;;  %681 = vmatpush1.bf16.msra.mxu1 %v4058_v46  ;;  %v782_v29 = vld [vmem:[#allocation7 + $0xe0] sm:$0xff]  ;;  %v3519_v46 = vcombine.high %v755_v38, %v759_v39 }
  0x70   :  { %682 = vmatprep.subr.bf16.mxu1 %v4059_v47  ;;  %v3548_v47 = vcombine.low %v786_v34, %v790_v35  ;;  %v826_v8 = vld [vmem:[#allocation7 + $0x240] sm:$0xff] }
  0x71   :  { %v830_v9 = vld [vmem:[#allocation7 + $0x260] sm:$0xff] }
  0x72   :  { %601 = vmatpush1.bf16.msra.mxu0 %v4004_v32  ;;  %v4083_v32 = vld [vmem:[#allocation5 + $0x228] ss:$16 sps:$4 sm:$0xff]   ;;  %v834_v16 = vld [vmem:[#allocation7 + $0x280] sm:$0xff] }
  0x73   :  { %602 = vmatprep.subr.bf16.mxu0 %v4005_v33  ;;  %683 = vmatpush1.bf16.msra.mxu1 %v4061_v50  ;;  %v3532_v33 = vcombine.low %v770_v22, %v774_v23  ;;  %v3588_v23 = vcombine.low %v826_v8, %v830_v9  ;;  %v850_v34 = vld [vmem:[#allocation7 + $0x300] sm:$0xff] }
  0x74   :  { %684 = vmatprep.subr.bf16.mxu1 %v4062_v51  ;;  %v3518_v51 = vcombine.low %v755_v38, %v759_v39  ;;  %v854_v35 = vld [vmem:[#allocation7 + $0x320] sm:$0xff]  ;;  %v823_v38 = vld [vmem:[#allocation7 + $0x228] sm:$0xff] }
  0x76   :  { %603 = vmatpush1.bf16.msra.mxu0 %v4007_v36  ;;  %v4086_v36 = vld [vmem:[#allocation5 + $0x24c] ss:$16 sps:$4 sm:$0x3f]  }
  0x77   :  { %604 = vmatprep.subr.bf16.mxu0 %v4008_v37  ;;  %685 = vmatpush1.bf16.msra.mxu1 %v4064_v54  ;;  %v3541_v37 = vcombine.high %v778_v28, %v782_v29 }
  0x78   :  { %686 = vmatprep.subr.bf16.mxu1 %v4065_v55 }
  0x7a   :  { %605 = vmatpush1.bf16.msra.mxu0 %v4010_v40  ;;  %v3540_v40 = vcombine.low %v778_v28, %v782_v29  ;;  %v811_v29 = vld [vmem:[#allocation7 + $0x1c8] sm:$0xff] }
  0x7b   :  { %606 = vmatprep.subr.bf16.mxu0 %v4011_v41  ;;  %687 = vmatpush1.bf16.msra.mxu1 %v4067_v59  ;;  %v794_v41 = vld [vmem:[#allocation7 + $0x140] sm:$0xff] }
  0x7c   :  { %688 = vmatprep.subr.bf16.mxu1 %v4068_v61  ;;  %v3557_v50 = vcombine.high %v794_v41, %v798_v42  ;;  %v3556_v55 = vcombine.low %v794_v41, %v798_v42  ;;  %v783_v61 = vld [vmem:[#allocation7 + $0xe8] sm:$0xff]  ;;  %v858_v42 = vld [vmem:[#allocation7 + $0x340] sm:$0xff] }
  0x7e   :  { %607 = vmatpush1.bf16.msra.mxu0 %v4013_v44  ;;  %v763_v44 = vld [vmem:[#allocation7 + $0x48] sm:$0xff] }
  0x7f   :  { %608 = vmatprep.subr.bf16.mxu0 %v4017_v45  ;;  %689 = vmatpush1.bf16.msra.mxu1 %v4070_v1  ;;  %v767_v45 = vld [vmem:[#allocation7 + $0x68] sm:$0xff]  ;;  %v822_v1 = vld [vmem:[#allocation7 + $0x220] sm:$0xff] }
  0x80   :  { %690 = vmatprep.subr.bf16.mxu1 %v4071_v2  ;;  %v3527_v54 = vcombine.high %v763_v44, %v767_v45  ;;  %v3526_v59 = vcombine.low %v763_v44, %v767_v45  ;;  %v3580_v15 = vcombine.low %v818_v0, %v822_v1  ;;  %v827_v45 = vld [vmem:[#allocation7 + $0x248] sm:$0xff] }
  0x82   :  { %609 = vmatpush1.bf16.msra.mxu0 %v4019_v48  ;;  %v802_v48 = vld [vmem:[#allocation7 + $0x180] sm:$0xff] }
  0x83   :  { %610 = vmatprep.subr.bf16.mxu0 %v4023_v49  ;;  %691 = vmatpush1.bf16.msra.mxu1 %v4073_v7  ;;  %v806_v49 = vld [vmem:[#allocation7 + $0x1a0] sm:$0xff] }
  0x84   :  { %692 = vmatprep.subr.bf16.mxu1 %v4074_v12  ;;  %v795_v12 = vld [vmem:[#allocation7 + $0x148] sm:$0xff] }
  0x86   :  { %611 = vmatpush1.bf16.msra.mxu0 %v4025_v52  ;;  %v771_v52 = vld [vmem:[#allocation7 + $0x88] sm:$0xff] }
  0x87   :  { %612 = vmatprep.subr.bf16.mxu0 %v4029_v53  ;;  %693 = vmatpush1.bf16.msra.mxu1 %v4076_v14  ;;  %v775_v53 = vld [vmem:[#allocation7 + $0xa8] sm:$0xff] }
  0x88   :  { %694 = vmatprep.subr.bf16.mxu1 %v4077_v17  ;;  %v3534_v3 = vcombine.low %v771_v52, %v775_v53  ;;  %v838_v17 = vld [vmem:[#allocation7 + $0x2a0] sm:$0xff] }
  0x8a   :  { %613 = vmatpush1.bf16.msra.mxu0 %v4031_v56  ;;  %v810_v56 = vld [vmem:[#allocation7 + $0x1c0] sm:$0xff] }
  0x8b   :  { %623 = vmatprep.subr.bf16.mxu0 %v4037_v58  ;;  %695 = vmatpush1.bf16.msra.mxu1 %v4079_v20  ;;  %v3565_v58 = vcombine.high %v802_v48, %v806_v49  ;;  %v3573_v2 = vcombine.high %v810_v56, %v814_v57  ;;  %v3572_v7 = vcombine.low %v810_v56, %v814_v57  ;;  %v803_v20 = vld [vmem:[#allocation7 + $0x188] sm:$0xff] }
  0x8c   :  { %705 = vmatprep.subr.bf16.mxu1 %v4082_v24  ;;  %v842_v24 = vld [vmem:[#allocation7 + $0x2c0] sm:$0xff]  ;;  %v843_v56 = vld [vmem:[#allocation7 + $0x2c8] sm:$0xff] }
  0x8d   :  { %615 = vmatmul.mubr.bf16.vlgmr.msra.gmra.mrb[0].mxu0 %v4433_v60  ;;  %v847_v57 = vld [vmem:[#allocation7 + $0x2e8] sm:$0xff] }
  0x8e   :  { %624 = vmatpush1.bf16.msra.mxu0 %v4035_v62  ;;  %655 = vmatprep.mubr.bf16.mxu0 %v4331_v5  ;;  %v3535_v62 = vcombine.high %v771_v52, %v775_v53  ;;  %v839_v52 = vld [vmem:[#allocation7 + $0x2a8] sm:$0xff] }
  0x8f   :  { %625 = vmatprep.subr.bf16.mxu0 %v4043_v63  ;;  %697 = vmatmul.mubr.bf16.vlgmr.msra.gmra.mrb[0].mxu1 %v4433_v60  ;;  %v779_v60 = vld [vmem:[#allocation7 + $0xc8] sm:$0xff]  ;;  %v3564_v63 = vcombine.low %v802_v48, %v806_v49 }
  0x90   :  { %706 = vmatpush1.bf16.msra.mxu1 %v4080_v26  ;;  %737 = vmatprep.mubr.bf16.mxu1 %v4331_v5  ;;  %v791_v5 = vld [vmem:[#allocation7 + $0x128] sm:$0xff]  ;;  %v3542_v11 = vcombine.low %v779_v60, %v783_v61 }
  0x91   :  { %707 = vmatprep.subr.bf16.mxu1 %v4085_v30  ;;  %v815_v30 = vld [vmem:[#allocation7 + $0x1e8] sm:$0xff] }
  0x92   :  { %626 = vmatpush1.bf16.msra.mxu0 %v4041_v4  ;;  %v787_v4 = vld [vmem:[#allocation7 + $0x108] sm:$0xff]  ;;  %v3574_v41 = vcombine.low %v811_v29, %v815_v30 }
  0x93   :  { %3512 = vmatprep.subr.msk.bf16.mxu0 %vm569_vm0, %v4047_v6  ;;  %v3543_v6 = vcombine.high %v779_v60, %v783_v61  ;;  %v3551_v14 = vcombine.high %v787_v4, %v791_v5  ;;  %v851_v60 = vld [vmem:[#allocation7 + $0x308] sm:$0xff] }
  0x94   :  { %708 = vmatpush1.bf16.msra.mxu1 %v4083_v32  ;;  %v855_v61 = vld [vmem:[#allocation7 + $0x328] sm:$0xff] }
  0x95   :  { %3514 = vmatprep.subr.msk.bf16.mxu1 %vm569_vm0, %v4086_v36  ;;  %v3575_v36 = vcombine.high %v811_v29, %v815_v30  ;;  %v169_v29 = vlaneseq }
  0x96   :  { %628 = vmatpush1.bf16.msra.mxu0 %v571_v10  ;;  %v3581_v10 = vcombine.high %v818_v0, %v822_v1  ;;  %v859_v0 = vld [vmem:[#allocation7 + $0x348] sm:$0xff] }
  0x97   :  { %2332 = vmatprep.subr.bf16.mxu0 %v3517_v18  ;;  %v3589_v18 = vcombine.high %v826_v8, %v830_v9  ;;  %v863_v1 = vld [vmem:[#allocation7 + $0x368] sm:$0xff]  ;;  %v4451_v30 = vshrl.u32 %v169_v29, 7 }
  0x98   :  { %710 = vmatpush1.bf16.msra.mxu1 %v4438_v13  ;;  %v799_v13 = vld [vmem:[#allocation7 + $0x168] sm:$0xff] }
  0x99   :  { %3513 = vmatmul.mubr.msk.bf16.vlgmr.msra.gmra.mrb[0].mxu0 %vm565_vm1, %v4441_v19  ;;  %2414 = vmatprep.subr.bf16.mxu1 %v3519_v46  ;;  %v3559_v22 = vcombine.high %v795_v12, %v799_v13  ;;  %v3558_v26 = vcombine.low %v795_v12, %v799_v13  ;;  %v831_v46 = vld [vmem:[#allocation7 + $0x268] sm:$0xff]  ;;  %v874_v13 = vld [vmem:[#allocation7 + $0x3c0] sm:$0xff] }
  0x9a   :  { %2333 = vmatpush1.bf16.msra.mxu0 %v3516_v21  ;;  %v807_v21 = vld [vmem:[#allocation7 + $0x1a8] sm:$0xff] }
  0x9b   :  { %2334 = vmatprep.subr.bf16.mxu0 %v3525_v25  ;;  %3515 = vmatmul.mubr.msk.bf16.vlgmr.msra.gmra.mrb[0].mxu1 %vm565_vm1, %v4441_v19  ;;  %v3550_v19 = vcombine.low %v787_v4, %v791_v5  ;;  %v3597_v25 = vcombine.high %v834_v16, %v838_v17  ;;  %v3567_v28 = vcombine.high %v803_v20, %v807_v21  ;;  %v866_v5 = vld [vmem:[#allocation7 + $0x380] sm:$0xff]  ;;  %v871_v9 = vld [vmem:[#allocation7 + $0x3a8] sm:$0xff] }
  0x9c   :  { %2415 = vmatpush1.bf16.msra.mxu1 %v3518_v51  ;;  %v835_v51 = vld [vmem:[#allocation7 + $0x288] sm:$0xff]  ;;  %v3622_v4 = vcombine.low %v859_v0, %v863_v1 }
  0x9d   :  { %2416 = vmatprep.subr.bf16.mxu1 %v3527_v54  ;;  %v3590_v54 = vcombine.low %v827_v45, %v831_v46 }
  0x9e   :  { %2335 = vmatpush1.bf16.msra.mxu0 %v3524_v27  ;;  %v846_v27 = vld [vmem:[#allocation7 + $0x2e0] sm:$0xff] }
  0x9f   :  { %2336 = vmatprep.subr.bf16.mxu0 %v3533_v31  ;;  %v3596_v31 = vcombine.low %v834_v16, %v838_v17  ;;  %v3605_v32 = vcombine.high %v842_v24, %v846_v27  ;;  %v3604_v39 = vcombine.low %v842_v24, %v846_v27  ;;  %v879_v17 = vld [vmem:[#allocation7 + $0x3e8] sm:$0xff] }
  0xa0   :  { %2417 = vmatpush1.bf16.msra.mxu1 %v3526_v59  ;;  %v3607_v59 = vcombine.high %v843_v56, %v847_v57 }
  0xa1   :  { %2418 = vmatprep.subr.bf16.mxu1 %v3535_v62  ;;  %v3606_v62 = vcombine.low %v843_v56, %v847_v57 }
  0xa2   :  { %2337 = vmatpush1.bf16.msra.mxu0 %v3532_v33  ;;  %v3566_v33 = vcombine.low %v803_v20, %v807_v21  ;;  %v882_v21 = vld [vmem:[#allocation7 + $0x400] sm:$0xff] }
  0xa3   :  { %2338 = vmatprep.subr.bf16.mxu0 %v3541_v37  ;;  %v819_v37 = vld [vmem:[#allocation7 + $0x208] sm:$0xff] }
  0xa4   :  { %2419 = vmatpush1.bf16.msra.mxu1 %v3534_v3  ;;  %v3583_v44 = vcombine.high %v819_v37, %v823_v38  ;;  %v3582_v49 = vcombine.low %v819_v37, %v823_v38  ;;  %v3623_v3 = vcombine.high %v859_v0, %v863_v1  ;;  %v183_v0 = vsub.s32 3, %v4451_v30 }
  0xa5   :  { %2420 = vmatprep.subr.bf16.mxu1 %v3543_v6  ;;  %v870_v6 = vld [vmem:[#allocation7 + $0x3a0] sm:$0xff] }
  0xa6   :  { %2339 = vmatpush1.bf16.msra.mxu0 %v3540_v40  ;;  %v3613_v40 = vcombine.high %v850_v34, %v854_v35  ;;  %v3629_v8 = vcombine.high %v866_v5, %v870_v6 }
  0xa7   :  { %2340 = vmatprep.subr.bf16.mxu0 %v3549_v43  ;;  %v862_v43 = vld [vmem:[#allocation7 + $0x360] sm:$0xff] }
  0xa8   :  { %2421 = vmatpush1.bf16.msra.mxu1 %v3542_v11  ;;  %v3621_v48 = vcombine.high %v858_v42, %v862_v43  ;;  %v3620_v53 = vcombine.low %v858_v42, %v862_v43  ;;  %v890_v43 = vld [vmem:[#allocation7 + $0x440] sm:$0xff] }
  0xa9   :  { %2422 = vmatprep.subr.bf16.mxu1 %v3551_v14  ;;  %v878_v14 = vld [vmem:[#allocation7 + $0x3e0] sm:$0xff] }
  0xaa   :  { %2341 = vmatpush1.bf16.msra.mxu0 %v3548_v47  ;;  %v3612_v47 = vcombine.low %v850_v34, %v854_v35  ;;  %v3637_v16 = vcombine.high %v874_v13, %v878_v14 }
  0xab   :  { %2342 = vmatprep.subr.bf16.mxu0 %v3557_v50  ;;  %v3591_v50 = vcombine.high %v827_v45, %v831_v46  ;;  %v894_v45 = vld [vmem:[#allocation7 + $0x460] sm:$0xff]  ;;  %v891_v46 = vld [vmem:[#allocation7 + $0x448] sm:$0xff] }
  0xac   :  { %2423 = vmatpush1.bf16.msra.mxu1 %v3550_v19  ;;  %v3652_v56 = vcombine.low %v890_v43, %v894_v45 }
  0xad   :  { %2424 = vmatprep.subr.bf16.mxu1 %v3559_v22  ;;  %v886_v22 = vld [vmem:[#allocation7 + $0x420] sm:$0xff] }
  0xae   :  { %2343 = vmatpush1.bf16.msra.mxu0 %v3556_v55  ;;  %v3599_v55 = vcombine.high %v835_v51, %v839_v52  ;;  %v3645_v24 = vcombine.high %v882_v21, %v886_v22 }
  0xaf   :  { %2344 = vmatprep.subr.bf16.mxu0 %v3565_v58  ;;  %v3598_v58 = vcombine.low %v835_v51, %v839_v52  ;;  %v898_v52 = vld [vmem:[#allocation7 + $0x480] sm:$0xff] }
  0xb0   :  { %2425 = vmatpush1.bf16.msra.mxu1 %v3558_v26  ;;  %v3644_v26 = vcombine.low %v882_v21, %v886_v22 }
  0xb1   :  { %2426 = vmatprep.subr.bf16.mxu1 %v3567_v28 }
  0xb2   :  { %2345 = vmatpush1.bf16.msra.mxu0 %v3564_v63  ;;  %v3615_v63 = vcombine.high %v851_v60, %v855_v61 }
  0xb3   :  { %2346 = vmatprep.subr.bf16.mxu0 %v3573_v2  ;;  %v3614_v2 = vcombine.low %v851_v60, %v855_v61  ;;  %v906_v60 = vld [vmem:[#allocation7 + $0x4c0] sm:$0xff] }
  0xb4   :  { %2427 = vmatpush1.bf16.msra.mxu1 %v3566_v33  ;;  %v175_v33 = vsub.s32 1, %v4451_v30  ;;  %v910_v61 = vld [vmem:[#allocation7 + $0x4e0] sm:$0xff] }
  0xb5   :  { %2428 = vmatprep.subr.bf16.mxu1 %v3575_v36 }
  0xb6   :  { %2347 = vmatpush1.bf16.msra.mxu0 %v3572_v7  ;;  %v867_v7 = vld [vmem:[#allocation7 + $0x388] sm:$0xff] }
  0xb7   :  { %2348 = vmatprep.subr.bf16.mxu0 %v3581_v10  ;;  %v3628_v10 = vcombine.low %v866_v5, %v870_v6  ;;  %v3630_v11 = vcombine.low %v867_v7, %v871_v9  ;;  %v3631_v12 = vcombine.high %v867_v7, %v871_v9  ;;  %v914_v5 = vld [vmem:[#allocation7 + $0x500] sm:$0xff]  ;;  %v915_v7 = vld [vmem:[#allocation7 + $0x508] sm:$0xff] }
  0xb8   :  { %2429 = vmatpush1.bf16.msra.mxu1 %v3574_v41  ;;  %v918_v6 = vld [vmem:[#allocation7 + $0x520] sm:$0xff] }
  0xb9   :  { %2430 = vmatprep.subr.bf16.mxu1 %v3583_v44 }
  0xba   :  { %2349 = vmatpush1.bf16.msra.mxu0 %v3580_v15  ;;  %v875_v15 = vld [vmem:[#allocation7 + $0x3c8] sm:$0xff] }
  0xbb   :  { %2350 = vmatprep.subr.bf16.mxu0 %v3589_v18  ;;  %v3636_v18 = vcombine.low %v874_v13, %v878_v14  ;;  %v3638_v19 = vcombine.low %v875_v15, %v879_v17  ;;  %v3639_v20 = vcombine.high %v875_v15, %v879_v17  ;;  %v3677_v13 = vcombine.high %v914_v5, %v918_v6  ;;  %v922_v15 = vld [vmem:[#allocation7 + $0x540] sm:$0xff] }
  0xbc   :  { %2431 = vmatpush1.bf16.msra.mxu1 %v3582_v49  ;;  %v926_v17 = vld [vmem:[#allocation7 + $0x560] sm:$0xff] }
  0xbd   :  { %2432 = vmatprep.subr.bf16.mxu1 %v3591_v50  ;;  %v3653_v50 = vcombine.high %v890_v43, %v894_v45  ;;  %v942_v43 = vld [vmem:[#allocation7 + $0x5e0] sm:$0xff]  ;;  %v943_v45 = vld [vmem:[#allocation7 + $0x5e8] sm:$0xff] }
  0xbe   :  { %2351 = vmatpush1.bf16.msra.mxu0 %v3588_v23  ;;  %v883_v23 = vld [vmem:[#allocation7 + $0x408] sm:$0xff] }
  0xbf   :  { %2352 = vmatprep.subr.bf16.mxu0 %v3597_v25  ;;  %v887_v25 = vld [vmem:[#allocation7 + $0x428] sm:$0xff] }
  0xc0   :  { %2433 = vmatpush1.bf16.msra.mxu1 %v3590_v54  ;;  %v3646_v27 = vcombine.low %v883_v23, %v887_v25  ;;  %v3647_v28 = vcombine.high %v883_v23, %v887_v25  ;;  %v899_v54 = vld [vmem:[#allocation7 + $0x488] sm:$0xff]  ;;  %v3676_v23 = vcombine.low %v914_v5, %v918_v6  ;;  %v962_v5 = vld [vmem:[#allocation7 + $0x680] sm:$0xff] }
  0xc1   :  { %2434 = vmatprep.subr.bf16.mxu1 %v3599_v55  ;;  %v903_v55 = vld [vmem:[#allocation7 + $0x4a8] sm:$0xff]  ;;  %v966_v6 = vld [vmem:[#allocation7 + $0x6a0] sm:$0xff] }
  0xc2   :  { %2353 = vmatpush1.bf16.msra.mxu0 %v3596_v31  ;;  %v171_v31 = vsub.s32 0, %v4451_v30 }
  0xc3   :  { %2354 = vmatprep.subr.bf16.mxu0 %v3605_v32  ;;  %v4457_v32 = vld [vmem:[%s4574_s2] sm:$0xf] }
  0xc4   :  { %2435 = vmatpush1.bf16.msra.mxu1 %v3598_v58  ;;  %v172_v34 = vrot.slane %v4457_v32, %v171_v31  ;;  %v176_v35 = vrot.slane %v4457_v32, %v175_v33  ;;  %v184_v9 = vrot.slane %v4457_v32, %v183_v0 }
  0xc5   :  { %2436 = vmatprep.subr.bf16.mxu1 %v3607_v59  ;;  %v3663_v59 = vcombine.high %v899_v54, %v903_v55 }
  0xc6   :  { %2355 = vmatpush1.bf16.msra.mxu0 %v3604_v39 }
  0xc7   :  { %2356 = vmatprep.subr.bf16.mxu0 %v3613_v40 }
  0xc8   :  { %2437 = vmatpush1.bf16.msra.mxu1 %v3606_v62  ;;  %v907_v62 = vld [vmem:[#allocation7 + $0x4c8] sm:$0xff] }
  0xc9   :  { %2438 = vmatprep.subr.bf16.mxu1 %v3615_v63  ;;  %v911_v63 = vld [vmem:[#allocation7 + $0x4e8] sm:$0xff] }
  0xca   :  { %2357 = vmatpush1.bf16.msra.mxu0 %v3612_v47  ;;  %v895_v47 = vld [vmem:[#allocation7 + $0x468] sm:$0xff] }
  0xcb   :  { %2358 = vmatprep.subr.bf16.mxu0 %v3621_v48  ;;  %v3655_v51 = vcombine.high %v891_v46, %v895_v47  ;;  %v3654_v57 = vcombine.low %v891_v46, %v895_v47 }
  0xcc   :  { %2439 = vmatpush1.bf16.msra.mxu1 %v3614_v2  ;;  %v3662_v2 = vcombine.low %v899_v54, %v903_v55  ;;  %v947_v54 = vld [vmem:[#allocation7 + $0x608] sm:$0xff] }
  0xcd   :  { %2440 = vmatprep.subr.bf16.mxu1 %v3623_v3  ;;  %v3669_v3 = vcombine.high %v906_v60, %v910_v61  ;;  %v951_v55 = vld [vmem:[#allocation7 + $0x628] sm:$0xff] }
  0xce   :  { %2359 = vmatpush1.bf16.msra.mxu0 %v3620_v53  ;;  %v902_v53 = vld [vmem:[#allocation7 + $0x4a0] sm:$0xff] }
  0xcf   :  { %2360 = vmatprep.subr.bf16.mxu0 %v3629_v8  ;;  %v3661_v58 = vcombine.high %v898_v52, %v902_v53  ;;  %v3660_v1 = vcombine.low %v898_v52, %v902_v53  ;;  %v919_v8 = vld [vmem:[#allocation7 + $0x528] sm:$0xff]  ;;  %v946_v52 = vld [vmem:[#allocation7 + $0x600] sm:$0xff] }
  0xd0   :  { %2441 = vmatpush1.bf16.msra.mxu1 %v3622_v4  ;;  %v3671_v4 = vcombine.high %v907_v62, %v911_v63  ;;  %v3679_v14 = vcombine.high %v915_v7, %v919_v8  ;;  %v950_v53 = vld [vmem:[#allocation7 + $0x620] sm:$0xff] }
  0xd1   :  { %2442 = vmatprep.subr.bf16.mxu1 %v3631_v12 }
  0xd2   :  { %2361 = vmatpush1.bf16.msra.mxu0 %v3628_v10  ;;  %v3668_v10 = vcombine.low %v906_v60, %v910_v61  ;;  %v954_v60 = vld [vmem:[#allocation7 + $0x640] sm:$0xff] }
  0xd3   :  { %2362 = vmatprep.subr.bf16.mxu0 %v3637_v16  ;;  %v958_v61 = vld [vmem:[#allocation7 + $0x660] sm:$0xff] }
  0xd4   :  { %2443 = vmatpush1.bf16.msra.mxu1 %v3630_v11  ;;  %v3670_v11 = vcombine.low %v907_v62, %v911_v63  ;;  %v955_v62 = vld [vmem:[#allocation7 + $0x648] sm:$0xff] }
  0xd5   :  { %2444 = vmatprep.subr.bf16.mxu1 %v3639_v20  ;;  %v959_v63 = vld [vmem:[#allocation7 + $0x668] sm:$0xff] }
  0xd6   :  { %2363 = vmatpush1.bf16.msra.mxu0 %v3636_v18  ;;  %v923_v18 = vld [vmem:[#allocation7 + $0x548] sm:$0xff] }
  0xd7   :  { %2373 = vmatprep.subr.bf16.mxu0 %v3645_v24  ;;  %v3678_v24 = vcombine.low %v915_v7, %v919_v8  ;;  %v963_v7 = vld [vmem:[#allocation7 + $0x688] sm:$0xff] }
  0xd8   :  { %2445 = vmatpush1.bf16.msra.mxu1 %v3638_v19  ;;  %v927_v19 = vld [vmem:[#allocation7 + $0x568] sm:$0xff] }
  0xd9   :  { %2455 = vmatprep.subr.bf16.mxu1 %v3647_v28  ;;  %v930_v28 = vld [vmem:[#allocation7 + $0x580] sm:$0xff]  ;;  %v967_v8 = vld [vmem:[#allocation7 + $0x6a8] sm:$0xff] }
 0x16c   :  { %v657_v36 = vpop.f32.mrb[0].mxu0 }
 0x16d   :  { %v3925_v37 = vadd.f32 %v657_v36, %v172_v34  ;;  %v659_v38 = vpop.f32.mrb[1].mxu0  ;;  %v934_v34 = vld [vmem:[#allocation7 + $0x5a0] sm:$0xff]  ;;  %v935_v36 = vld [vmem:[#allocation7 + $0x5a8] sm:$0xff] }
 0x16e   :  { %v3926_v39 = vadd.f32 %v659_v38, %v176_v35  ;;  %v661_v40 = vpop.f32.mrb[2].mxu0  ;;  %v4478_v12 = vpop.f32.mrb[0].mxu1  ;;  %v931_v35 = vld [vmem:[#allocation7 + $0x588] sm:$0xff]  ;;  %v3684_v38 = vcombine.low %v922_v15, %v926_v17  ;;  %v3692_v46 = vcombine.low %v930_v28, %v934_v34 }
 0x16f   :  { %v746_v41 = vmax.f32 %v3925_v37, 0.0  ;;  %v662_v42 = vpop.f32.mrb[3].mxu0  ;;  %v741_v16 = vpop.f32.mrb[1].mxu1  ;;  %v3693_v40 = vcombine.high %v930_v28, %v934_v34  ;;  %v3694_v47 = vcombine.low %v931_v35, %v935_v36 }
 0x170   :  { %v747_v44 = vmax.f32 %v3926_v39, 0.0  ;;  %v3928_v20 = vadd.f32 %v741_v16, %v184_v9  ;;  %v743_v21 = vpop.f32.mrb[2].mxu1  ;;  %v3686_v39 = vcombine.low %v923_v18, %v927_v19  ;;  %v938_v42 = vld [vmem:[#allocation7 + $0x5c0] sm:$0xff]  ;;  %v3716_v9 = vcombine.low %v954_v60, %v958_v61  ;;  %v971_v16 = vld [vmem:[#allocation7 + $0x6c8] sm:$0xff] }
 0x171   :  { %v4468_v49 = vpack.c.bf16 %v746_v41, %v746_v41  ;;  %v744_v22 = vpop.f32.mrb[3].mxu1  ;;  %v3695_v41 = vcombine.high %v931_v35, %v935_v36  ;;  %v986_v35 = vld [vmem:[#allocation7 + $0x740] sm:$0xff] }
 0x172   :  { %v4466_v48 = vpack.c.bf16 %v747_v44, %v747_v44  ;;  %v749_v25 = vmax.f32 %v3928_v20, 0.0  ;;  %v939_v44 = vld [vmem:[#allocation7 + $0x5c8] sm:$0xff]  ;;  %v978_v22 = vld [vmem:[#allocation7 + $0x700] sm:$0xff] }
 0x173   :  { %v990_v36 = vld [vmem:[#allocation7 + $0x760] sm:$0xff] }
 0x174   :  { %2364 = vmatprep.mubr.bf16.mxu0 %v4466_v48  ;;  %2446 = vmatprep.mubr.bf16.mxu1 %v4466_v48  ;;  %v4480_v37 = vpack.c.bf16 %v749_v25, %v749_v25  ;;  %v983_v25 = vld [vmem:[#allocation7 + $0x728] sm:$0xff] }
 0x175   :  { %2365 = vmatmul.mubr.bf16.vlgmr.msra.gmra.mrb[4].mxu0 %v4468_v49  ;;  %2447 = vmatmul.mubr.bf16.vlgmr.msra.gmra.mrb[4].mxu1 %v4468_v49 }
 0x176   :  { %2374 = vmatpush1.bf16.msra.mxu0 %v3644_v26  ;;  %2456 = vmatpush1.bf16.msra.mxu1 %v3646_v27  ;;  %v3685_v26 = vcombine.high %v922_v15, %v926_v17  ;;  %v3687_v27 = vcombine.high %v923_v18, %v927_v19  ;;  %v974_v15 = vld [vmem:[#allocation7 + $0x6e0] sm:$0xff]  ;;  %v975_v17 = vld [vmem:[#allocation7 + $0x6e8] sm:$0xff]  ;;  %v3724_v18 = vcombine.low %v962_v5, %v966_v6 }
 0x177   :  { %2375 = vmatprep.subr.bf16.mxu0 %v3653_v50  ;;  %2457 = vmatprep.subr.bf16.mxu1 %v3655_v51  ;;  %v3701_v50 = vcombine.high %v938_v42, %v942_v43  ;;  %v3703_v51 = vcombine.high %v939_v44, %v943_v45  ;;  %v3726_v19 = vcombine.low %v963_v7, %v967_v8 }
 0x178   :  { %2405 = vmatprep.mubr.bf16.mxu0 %v4480_v37  ;;  %2487 = vmatprep.mubr.bf16.mxu1 %v4480_v37  ;;  %v3735_v21 = vcombine.high %v971_v16, %v975_v17 }
 0x17a   :  { %2376 = vmatpush1.bf16.msra.mxu0 %v3652_v56  ;;  %2458 = vmatpush1.bf16.msra.mxu1 %v3654_v57  ;;  %v3700_v56 = vcombine.low %v938_v42, %v942_v43  ;;  %v3702_v57 = vcombine.low %v939_v44, %v943_v45  ;;  %v179_v42 = vsub.s32 2, %v4451_v30  ;;  %v3749_v43 = vcombine.high %v986_v35, %v990_v36  ;;  %v994_v45 = vld [vmem:[#allocation7 + $0x780] sm:$0xff] }
 0x17b   :  { %2377 = vmatprep.subr.bf16.mxu0 %v3661_v58  ;;  %2459 = vmatprep.subr.bf16.mxu1 %v3663_v59  ;;  %v3709_v58 = vcombine.high %v946_v52, %v950_v53  ;;  %v3711_v59 = vcombine.high %v947_v54, %v951_v55 }
 0x17e   :  { %2378 = vmatpush1.bf16.msra.mxu0 %v3660_v1  ;;  %2460 = vmatpush1.bf16.msra.mxu1 %v3662_v2  ;;  %v3708_v1 = vcombine.low %v946_v52, %v950_v53  ;;  %v3710_v2 = vcombine.low %v947_v54, %v951_v55  ;;  %v180_v53 = vrot.slane %v4457_v32, %v179_v42  ;;  %v760_v32 = vld [vmem:[#allocation7 + $0x30] sm:$0xff] }
 0x17f   :  { %2379 = vmatprep.subr.bf16.mxu0 %v3669_v3  ;;  %2461 = vmatprep.subr.bf16.mxu1 %v3671_v4  ;;  %v3717_v3 = vcombine.high %v954_v60, %v958_v61  ;;  %v3719_v4 = vcombine.high %v955_v62, %v959_v63 }
 0x182   :  { %2380 = vmatpush1.bf16.msra.mxu0 %v3668_v10  ;;  %2462 = vmatpush1.bf16.msra.mxu1 %v3670_v11  ;;  %v3718_v10 = vcombine.low %v955_v62, %v959_v63  ;;  %v3725_v11 = vcombine.high %v962_v5, %v966_v6  ;;  %v3927_v62 = vadd.f32 %v4478_v12, %v180_v53  ;;  %v765_v12 = vld [vmem:[#allocation7 + $0x58] sm:$0xff] }
 0x183   :  { %2381 = vmatprep.subr.bf16.mxu0 %v3677_v13  ;;  %2463 = vmatprep.subr.bf16.mxu1 %v3679_v14  ;;  %v3727_v13 = vcombine.high %v963_v7, %v967_v8  ;;  %v970_v14 = vld [vmem:[#allocation7 + $0x6c0] sm:$0xff]  ;;  %v797_v53 = vld [vmem:[#allocation7 + $0x158] sm:$0xff] }
 0x184   :  { %v3733_v20 = vcombine.high %v970_v14, %v974_v15  ;;  %v748_v7 = vmax.f32 %v3927_v62, 0.0  ;;  %v809_v62 = vld [vmem:[#allocation7 + $0x1b8] sm:$0xff] }
 0x186   :  { %2382 = vmatpush1.bf16.msra.mxu0 %v3676_v23  ;;  %2464 = vmatpush1.bf16.msra.mxu1 %v3678_v24  ;;  %v982_v23 = vld [vmem:[#allocation7 + $0x720] sm:$0xff]  ;;  %v979_v24 = vld [vmem:[#allocation7 + $0x708] sm:$0xff] }
 0x187   :  { %2383 = vmatprep.subr.bf16.mxu0 %v3685_v26  ;;  %2465 = vmatprep.subr.bf16.mxu1 %v3687_v27  ;;  %v3732_v26 = vcombine.low %v970_v14, %v974_v15  ;;  %v3734_v27 = vcombine.low %v971_v16, %v975_v17  ;;  %v3741_v28 = vcombine.high %v978_v22, %v982_v23 }
 0x188   :  { %v3743_v34 = vcombine.high %v979_v24, %v983_v25  ;;  %v4489_v15 = vpack.c.bf16 %v748_v7, %v748_v7 }
 0x18a   :  { %2384 = vmatpush1.bf16.msra.mxu0 %v3684_v38  ;;  %2466 = vmatpush1.bf16.msra.mxu1 %v3686_v39  ;;  %v987_v38 = vld [vmem:[#allocation7 + $0x748] sm:$0xff] }
 0x18b   :  { %2385 = vmatprep.subr.bf16.mxu0 %v3693_v40  ;;  %2467 = vmatprep.subr.bf16.mxu1 %v3695_v41  ;;  %v991_v39 = vld [vmem:[#allocation7 + $0x768] sm:$0xff]  ;;  %v3740_v40 = vcombine.low %v978_v22, %v982_v23  ;;  %v3742_v41 = vcombine.low %v979_v24, %v983_v25  ;;  %v777_v22 = vld [vmem:[#allocation7 + $0xb8] sm:$0xff] }
 0x18c   :  { %v3751_v44 = vcombine.high %v987_v38, %v991_v39  ;;  %v3750_v52 = vcombine.low %v987_v38, %v991_v39 }
 0x18e   :  { %2386 = vmatpush1.bf16.msra.mxu0 %v3692_v46  ;;  %2468 = vmatpush1.bf16.msra.mxu1 %v3694_v47  ;;  %v998_v46 = vld [vmem:[#allocation7 + $0x7a0] sm:$0xff]  ;;  %v995_v47 = vld [vmem:[#allocation7 + $0x788] sm:$0xff] }
 0x18f   :  { %2387 = vmatprep.subr.bf16.mxu0 %v3701_v50  ;;  %2469 = vmatprep.subr.bf16.mxu1 %v3703_v51  ;;  %v999_v50 = vld [vmem:[#allocation7 + $0x7a8] sm:$0xff]  ;;  %v3748_v51 = vcombine.low %v986_v35, %v990_v36  ;;  %v3757_v54 = vcombine.high %v994_v45, %v998_v46  ;;  %v3756_v60 = vcombine.low %v994_v45, %v998_v46  ;;  %v785_v35 = vld [vmem:[#allocation7 + $0xf8] sm:$0xff] }
 0x190   :  { %v3759_v55 = vcombine.high %v995_v47, %v999_v50  ;;  %v3758_v61 = vcombine.low %v995_v47, %v999_v50 }
 0x192   :  { %2388 = vmatpush1.bf16.msra.mxu0 %v3700_v56  ;;  %2470 = vmatpush1.bf16.msra.mxu1 %v3702_v57  ;;  %v1002_v56 = vld [vmem:[#allocation7 + $0x7c0] sm:$0xff] }
 0x193   :  { %2389 = vmatprep.subr.bf16.mxu0 %v3709_v58  ;;  %2471 = vmatprep.subr.bf16.mxu1 %v3711_v59  ;;  %v1006_v57 = vld [vmem:[#allocation7 + $0x7e0] sm:$0xff]  ;;  %v1003_v58 = vld [vmem:[#allocation7 + $0x7c8] sm:$0xff] }
 0x194   :  { %v1007_v59 = vld [vmem:[#allocation7 + $0x7e8] sm:$0xff]  ;;  %v3765_v63 = vcombine.high %v1002_v56, %v1006_v57  ;;  %v3764_v5 = vcombine.low %v1002_v56, %v1006_v57 }
 0x195   :  { %v3766_v6 = vcombine.low %v1003_v58, %v1007_v59 }
 0x196   :  { %2390 = vmatpush1.bf16.msra.mxu0 %v3708_v1  ;;  %2472 = vmatpush1.bf16.msra.mxu1 %v3710_v2  ;;  %v3767_v1 = vcombine.high %v1003_v58, %v1007_v59  ;;  %v756_v2 = vld [vmem:[#allocation7 + $0x10] sm:$0xff] }
 0x197   :  { %2391 = vmatprep.subr.bf16.mxu0 %v3717_v3  ;;  %2473 = vmatprep.subr.bf16.mxu1 %v3719_v4  ;;  %v757_v3 = vld [vmem:[#allocation7 + $0x18] sm:$0xff]  ;;  %v3521_v8 = vcombine.high %v756_v2, %v760_v32  ;;  %v3520_v14 = vcombine.low %v756_v2, %v760_v32  ;;  %v804_v59 = vld [vmem:[#allocation7 + $0x190] sm:$0xff] }
 0x198   :  { %v761_v4 = vld [vmem:[#allocation7 + $0x38] sm:$0xff] }
 0x199   :  { %v3522_v16 = vcombine.low %v757_v3, %v761_v4 }
 0x19a   :  { %2392 = vmatpush1.bf16.msra.mxu0 %v3716_v9  ;;  %2474 = vmatpush1.bf16.msra.mxu1 %v3718_v10  ;;  %v3523_v9 = vcombine.high %v757_v3, %v761_v4  ;;  %v764_v10 = vld [vmem:[#allocation7 + $0x50] sm:$0xff] }
 0x19b   :  { %2393 = vmatprep.subr.bf16.mxu0 %v3725_v11  ;;  %2475 = vmatprep.subr.bf16.mxu1 %v3727_v13  ;;  %v768_v11 = vld [vmem:[#allocation7 + $0x70] sm:$0xff]  ;;  %v769_v13 = vld [vmem:[#allocation7 + $0x78] sm:$0xff] }
 0x19c   :  { %v3529_v17 = vcombine.high %v764_v10, %v768_v11  ;;  %v3528_v23 = vcombine.low %v764_v10, %v768_v11  ;;  %v3530_v24 = vcombine.low %v765_v12, %v769_v13  ;;  %v812_v3 = vld [vmem:[#allocation7 + $0x1d0] sm:$0xff] }
 0x19d   :  { %v816_v4 = vld [vmem:[#allocation7 + $0x1f0] sm:$0xff] }
 0x19e   :  { %2394 = vmatpush1.bf16.msra.mxu0 %v3724_v18  ;;  %2476 = vmatpush1.bf16.msra.mxu1 %v3726_v19  ;;  %v3531_v18 = vcombine.high %v765_v12, %v769_v13  ;;  %v772_v19 = vld [vmem:[#allocation7 + $0x90] sm:$0xff]  ;;  %v821_v13 = vld [vmem:[#allocation7 + $0x218] sm:$0xff] }
 0x19f   :  { %2395 = vmatprep.subr.bf16.mxu0 %v3733_v20  ;;  %2477 = vmatprep.subr.bf16.mxu1 %v3735_v21  ;;  %v776_v20 = vld [vmem:[#allocation7 + $0xb0] sm:$0xff]  ;;  %v773_v21 = vld [vmem:[#allocation7 + $0x98] sm:$0xff] }
 0x1a0   :  { %v3537_v25 = vcombine.high %v772_v19, %v776_v20  ;;  %v3536_v36 = vcombine.low %v772_v19, %v776_v20  ;;  %v3538_v38 = vcombine.low %v773_v21, %v777_v22  ;;  %v820_v11 = vld [vmem:[#allocation7 + $0x210] sm:$0xff] }
 0x1a1   :  { %v824_v12 = vld [vmem:[#allocation7 + $0x230] sm:$0xff] }
 0x1a2   :  { %2396 = vmatpush1.bf16.msra.mxu0 %v3732_v26  ;;  %2478 = vmatpush1.bf16.msra.mxu1 %v3734_v27  ;;  %v3539_v26 = vcombine.high %v773_v21, %v777_v22  ;;  %v780_v27 = vld [vmem:[#allocation7 + $0xd0] sm:$0xff]  ;;  %v829_v22 = vld [vmem:[#allocation7 + $0x258] sm:$0xff] }
 0x1a3   :  { %2397 = vmatprep.subr.bf16.mxu0 %v3741_v28  ;;  %2479 = vmatprep.subr.bf16.mxu1 %v3743_v34  ;;  %v784_v28 = vld [vmem:[#allocation7 + $0xf0] sm:$0xff]  ;;  %v781_v34 = vld [vmem:[#allocation7 + $0xd8] sm:$0xff] }
 0x1a4   :  { %v3545_v39 = vcombine.high %v780_v27, %v784_v28  ;;  %v3544_v45 = vcombine.low %v780_v27, %v784_v28  ;;  %v3546_v46 = vcombine.low %v781_v34, %v785_v35  ;;  %v828_v20 = vld [vmem:[#allocation7 + $0x250] sm:$0xff] }
 0x1a5   :  { %v832_v21 = vld [vmem:[#allocation7 + $0x270] sm:$0xff] }
 0x1a6   :  { %2398 = vmatpush1.bf16.msra.mxu0 %v3740_v40  ;;  %2480 = vmatpush1.bf16.msra.mxu1 %v3742_v41  ;;  %v3547_v40 = vcombine.high %v781_v34, %v785_v35  ;;  %v788_v41 = vld [vmem:[#allocation7 + $0x110] sm:$0xff]  ;;  %v837_v35 = vld [vmem:[#allocation7 + $0x298] sm:$0xff] }
 0x1a7   :  { %2399 = vmatprep.subr.bf16.mxu0 %v3749_v43  ;;  %2481 = vmatprep.subr.bf16.mxu1 %v3751_v44  ;;  %v792_v43 = vld [vmem:[#allocation7 + $0x130] sm:$0xff]  ;;  %v793_v44 = vld [vmem:[#allocation7 + $0x138] sm:$0xff] }
 0x1a8   :  { %v3553_v47 = vcombine.high %v788_v41, %v792_v43  ;;  %v836_v28 = vld [vmem:[#allocation7 + $0x290] sm:$0xff] }
 0x1a9   :  { %v840_v34 = vld [vmem:[#allocation7 + $0x2b0] sm:$0xff] }
 0x1aa   :  { %2400 = vmatpush1.bf16.msra.mxu0 %v3748_v51  ;;  %2482 = vmatpush1.bf16.msra.mxu1 %v3750_v52  ;;  %v796_v51 = vld [vmem:[#allocation7 + $0x150] sm:$0xff] }
 0x1ab   :  { %2401 = vmatprep.subr.bf16.mxu0 %v3757_v54  ;;  %2483 = vmatprep.subr.bf16.mxu1 %v3759_v55  ;;  %v800_v52 = vld [vmem:[#allocation7 + $0x170] sm:$0xff]  ;;  %v801_v54 = vld [vmem:[#allocation7 + $0x178] sm:$0xff]  ;;  %v3552_v55 = vcombine.low %v788_v41, %v792_v43 }
 0x1ac   :  { %v3561_v57 = vcombine.high %v796_v51, %v800_v52  ;;  %v3563_v58 = vcombine.high %v797_v53, %v801_v54  ;;  %v844_v43 = vld [vmem:[#allocation7 + $0x2d0] sm:$0xff] }
 0x1ae   :  { %2402 = vmatpush1.bf16.msra.mxu0 %v3756_v60  ;;  %2484 = vmatpush1.bf16.msra.mxu1 %v3758_v61  ;;  %v808_v60 = vld [vmem:[#allocation7 + $0x1b0] sm:$0xff]  ;;  %v805_v61 = vld [vmem:[#allocation7 + $0x198] sm:$0xff] }
 0x1af   :  { %2403 = vmatprep.subr.bf16.mxu0 %v3765_v63  ;;  %2485 = vmatprep.subr.bf16.mxu1 %v3767_v1  ;;  %v3560_v63 = vcombine.low %v796_v51, %v800_v52  ;;  %v3562_v1 = vcombine.low %v797_v53, %v801_v54  ;;  %v3569_v2 = vcombine.high %v804_v59, %v808_v60  ;;  %v852_v52 = vld [vmem:[#allocation7 + $0x310] sm:$0xff]  ;;  %v853_v54 = vld [vmem:[#allocation7 + $0x318] sm:$0xff] }
 0x1b0   :  { %v3571_v32 = vcombine.high %v805_v61, %v809_v62  ;;  %v3568_v7 = vcombine.low %v804_v59, %v808_v60  ;;  %v856_v53 = vld [vmem:[#allocation7 + $0x330] sm:$0xff] }
 0x1b1   :  { %v860_v60 = vld [vmem:[#allocation7 + $0x350] sm:$0xff] }
 0x1b2   :  { %2404 = vmatpush1.bf16.msra.mxu0 %v3764_v5  ;;  %2486 = vmatpush1.bf16.msra.mxu1 %v3766_v6  ;;  %v813_v5 = vld [vmem:[#allocation7 + $0x1d8] sm:$0xff] }
 0x1b3   :  { %2496 = vmatprep.subr.bf16.mxu0 %v3521_v8  ;;  %2578 = vmatprep.subr.bf16.mxu1 %v3523_v9  ;;  %v817_v6 = vld [vmem:[#allocation7 + $0x1f8] sm:$0xff]  ;;  %v3570_v8 = vcombine.low %v805_v61, %v809_v62  ;;  %v3577_v9 = vcombine.high %v812_v3, %v816_v4  ;;  %v864_v61 = vld [vmem:[#allocation7 + $0x370] sm:$0xff] }
 0x1b4   :  { %v3579_v10 = vcombine.high %v813_v5, %v817_v6  ;;  %v861_v62 = vld [vmem:[#allocation7 + $0x358] sm:$0xff] }
 0x1b5   :  { %2406 = vmatmul.mubr.bf16.vlgmr.msra.gmra.mrb[4].mxu0 %v4489_v15  ;;  %2488 = vmatmul.mubr.bf16.vlgmr.msra.gmra.mrb[4].mxu1 %v4489_v15 }
 0x1b6   :  { %2497 = vmatpush1.bf16.msra.mxu0 %v3520_v14  ;;  %2528 = vmatprep.mubr.bf16.mxu0 %v4466_v48  ;;  %v825_v14 = vld [vmem:[#allocation7 + $0x238] sm:$0xff] }
 0x1b7   :  { %2579 = vmatpush1.bf16.msra.mxu1 %v3522_v16  ;;  %2610 = vmatprep.mubr.bf16.mxu1 %v4466_v48  ;;  %v789_v48 = vld [vmem:[#allocation7 + $0x118] sm:$0xff]  ;;  %v3576_v16 = vcombine.low %v812_v3, %v816_v4  ;;  %v3587_v19 = vcombine.high %v821_v13, %v825_v14  ;;  %v868_v4 = vld [vmem:[#allocation7 + $0x390] sm:$0xff] }
 0x1b8   :  { %2498 = vmatprep.subr.bf16.mxu0 %v3529_v17  ;;  %2580 = vmatprep.subr.bf16.mxu1 %v3531_v18  ;;  %v3555_v50 = vcombine.high %v789_v48, %v793_v44  ;;  %v3554_v56 = vcombine.low %v789_v48, %v793_v44  ;;  %v3578_v17 = vcombine.low %v813_v5, %v817_v6  ;;  %v848_v48 = vld [vmem:[#allocation7 + $0x2f0] sm:$0xff]  ;;  %v845_v44 = vld [vmem:[#allocation7 + $0x2d8] sm:$0xff] }
 0x1b9   :  { %v3585_v18 = vcombine.high %v820_v11, %v824_v12  ;;  %v872_v5 = vld [vmem:[#allocation7 + $0x3b0] sm:$0xff]  ;;  %v869_v6 = vld [vmem:[#allocation7 + $0x398] sm:$0xff] }
 0x1ba   :  { %2499 = vmatpush1.bf16.msra.mxu0 %v3528_v23  ;;  %v833_v23 = vld [vmem:[#allocation7 + $0x278] sm:$0xff] }
 0x1bb   :  { %2581 = vmatpush1.bf16.msra.mxu1 %v3530_v24  ;;  %2500 = vmatprep.subr.bf16.mxu0 %v3537_v25  ;;  %v3584_v24 = vcombine.low %v820_v11, %v824_v12  ;;  %v3586_v25 = vcombine.low %v821_v13, %v825_v14  ;;  %v3595_v27 = vcombine.high %v829_v22, %v833_v23  ;;  %v876_v12 = vld [vmem:[#allocation7 + $0x3d0] sm:$0xff]  ;;  %v877_v14 = vld [vmem:[#allocation7 + $0x3d8] sm:$0xff] }
 0x1bc   :  { %2582 = vmatprep.subr.bf16.mxu1 %v3539_v26  ;;  %v3593_v26 = vcombine.high %v828_v20, %v832_v21  ;;  %v880_v13 = vld [vmem:[#allocation7 + $0x3f0] sm:$0xff] }
 0x1be   :  { %2501 = vmatpush1.bf16.msra.mxu0 %v3536_v36  ;;  %v841_v36 = vld [vmem:[#allocation7 + $0x2b8] sm:$0xff] }
 0x1bf   :  { %2583 = vmatpush1.bf16.msra.mxu1 %v3538_v38  ;;  %2502 = vmatprep.subr.bf16.mxu0 %v3545_v39  ;;  %v3592_v38 = vcombine.low %v828_v20, %v832_v21  ;;  %v3594_v39 = vcombine.low %v829_v22, %v833_v23  ;;  %v3603_v41 = vcombine.high %v837_v35, %v841_v36  ;;  %v884_v21 = vld [vmem:[#allocation7 + $0x410] sm:$0xff]  ;;  %v885_v23 = vld [vmem:[#allocation7 + $0x418] sm:$0xff] }
 0x1c0   :  { %2584 = vmatprep.subr.bf16.mxu1 %v3547_v40  ;;  %v3601_v40 = vcombine.high %v836_v28, %v840_v34  ;;  %v888_v22 = vld [vmem:[#allocation7 + $0x430] sm:$0xff] }
 0x1c2   :  { %2503 = vmatpush1.bf16.msra.mxu0 %v3544_v45  ;;  %v849_v45 = vld [vmem:[#allocation7 + $0x2f8] sm:$0xff] }
 0x1c3   :  { %2585 = vmatpush1.bf16.msra.mxu1 %v3546_v46  ;;  %2504 = vmatprep.subr.bf16.mxu0 %v3553_v47  ;;  %v3600_v46 = vcombine.low %v836_v28, %v840_v34  ;;  %v3602_v47 = vcombine.low %v837_v35, %v841_v36  ;;  %v3611_v51 = vcombine.high %v845_v44, %v849_v45  ;;  %v892_v34 = vld [vmem:[#allocation7 + $0x450] sm:$0xff] }
 0x1c4   :  { %2586 = vmatprep.subr.bf16.mxu1 %v3555_v50  ;;  %v3609_v50 = vcombine.high %v844_v43, %v848_v48  ;;  %v896_v35 = vld [vmem:[#allocation7 + $0x470] sm:$0xff]  ;;  %v3648_v36 = vcombine.low %v884_v21, %v888_v22 }
 0x1c6   :  { %2505 = vmatpush1.bf16.msra.mxu0 %v3552_v55  ;;  %v857_v55 = vld [vmem:[#allocation7 + $0x338] sm:$0xff] }
 0x1c7   :  { %2587 = vmatpush1.bf16.msra.mxu1 %v3554_v56  ;;  %2506 = vmatprep.subr.bf16.mxu0 %v3561_v57  ;;  %v3608_v56 = vcombine.low %v844_v43, %v848_v48  ;;  %v3610_v57 = vcombine.low %v845_v44, %v849_v45  ;;  %v3619_v59 = vcombine.high %v853_v54, %v857_v55  ;;  %v900_v43 = vld [vmem:[#allocation7 + $0x490] sm:$0xff]  ;;  %v901_v45 = vld [vmem:[#allocation7 + $0x498] sm:$0xff] }
 0x1c8   :  { %2588 = vmatprep.subr.bf16.mxu1 %v3563_v58  ;;  %v3617_v58 = vcombine.high %v852_v52, %v856_v53  ;;  %v904_v48 = vld [vmem:[#allocation7 + $0x4b0] sm:$0xff] }
 0x1ca   :  { %2507 = vmatpush1.bf16.msra.mxu0 %v3560_v63  ;;  %v865_v63 = vld [vmem:[#allocation7 + $0x378] sm:$0xff] }
 0x1cb   :  { %2589 = vmatpush1.bf16.msra.mxu1 %v3562_v1  ;;  %2508 = vmatprep.subr.bf16.mxu0 %v3569_v2  ;;  %v3616_v1 = vcombine.low %v852_v52, %v856_v53  ;;  %v3618_v2 = vcombine.low %v853_v54, %v857_v55  ;;  %v3627_v3 = vcombine.high %v861_v62, %v865_v63  ;;  %v908_v53 = vld [vmem:[#allocation7 + $0x4d0] sm:$0xff]  ;;  %v909_v55 = vld [vmem:[#allocation7 + $0x4d8] sm:$0xff] }
 0x1cc   :  { %2590 = vmatprep.subr.bf16.mxu1 %v3571_v32  ;;  %v3625_v32 = vcombine.high %v860_v60, %v864_v61  ;;  %v912_v54 = vld [vmem:[#allocation7 + $0x4f0] sm:$0xff] }
 0x1ce   :  { %2509 = vmatpush1.bf16.msra.mxu0 %v3568_v7  ;;  %v873_v7 = vld [vmem:[#allocation7 + $0x3b8] sm:$0xff] }
 0x1cf   :  { %2591 = vmatpush1.bf16.msra.mxu1 %v3570_v8  ;;  %2510 = vmatprep.subr.bf16.mxu0 %v3577_v9  ;;  %v3624_v8 = vcombine.low %v860_v60, %v864_v61  ;;  %v3626_v9 = vcombine.low %v861_v62, %v865_v63  ;;  %v3635_v11 = vcombine.high %v869_v6, %v873_v7  ;;  %v916_v60 = vld [vmem:[#allocation7 + $0x510] sm:$0xff]  ;;  %v917_v62 = vld [vmem:[#allocation7 + $0x518] sm:$0xff] }
 0x1d0   :  { %2592 = vmatprep.subr.bf16.mxu1 %v3579_v10  ;;  %v3633_v10 = vcombine.high %v868_v4, %v872_v5  ;;  %v920_v61 = vld [vmem:[#allocation7 + $0x530] sm:$0xff]  ;;  %v921_v63 = vld [vmem:[#allocation7 + $0x538] sm:$0xff] }
 0x1d2   :  { %2511 = vmatpush1.bf16.msra.mxu0 %v3576_v16  ;;  %v881_v16 = vld [vmem:[#allocation7 + $0x3f8] sm:$0xff] }
 0x1d3   :  { %2593 = vmatpush1.bf16.msra.mxu1 %v3578_v17  ;;  %2512 = vmatprep.subr.bf16.mxu0 %v3585_v18  ;;  %v3632_v17 = vcombine.low %v868_v4, %v872_v5  ;;  %v3634_v18 = vcombine.low %v869_v6, %v873_v7  ;;  %v3643_v20 = vcombine.high %v877_v14, %v881_v16  ;;  %v928_v4 = vld [vmem:[#allocation7 + $0x570] sm:$0xff]  ;;  %v925_v5 = vld [vmem:[#allocation7 + $0x558] sm:$0xff] }
 0x1d4   :  { %2594 = vmatprep.subr.bf16.mxu1 %v3587_v19  ;;  %v3641_v19 = vcombine.high %v876_v12, %v880_v13  ;;  %v929_v6 = vld [vmem:[#allocation7 + $0x578] sm:$0xff]  ;;  %v3680_v7 = vcombine.low %v916_v60, %v920_v61 }
 0x1d6   :  { %2513 = vmatpush1.bf16.msra.mxu0 %v3584_v24  ;;  %v889_v24 = vld [vmem:[#allocation7 + $0x438] sm:$0xff] }
 0x1d7   :  { %2595 = vmatpush1.bf16.msra.mxu1 %v3586_v25  ;;  %2514 = vmatprep.subr.bf16.mxu0 %v3593_v26  ;;  %v3640_v25 = vcombine.low %v876_v12, %v880_v13  ;;  %v3642_v26 = vcombine.low %v877_v14, %v881_v16  ;;  %v3651_v28 = vcombine.high %v885_v23, %v889_v24  ;;  %v936_v12 = vld [vmem:[#allocation7 + $0x5b0] sm:$0xff]  ;;  %v933_v13 = vld [vmem:[#allocation7 + $0x598] sm:$0xff] }
 0x1d8   :  { %2596 = vmatprep.subr.bf16.mxu1 %v3595_v27  ;;  %v3649_v27 = vcombine.high %v884_v21, %v888_v22  ;;  %v937_v14 = vld [vmem:[#allocation7 + $0x5b8] sm:$0xff]  ;;  %v944_v21 = vld [vmem:[#allocation7 + $0x5f0] sm:$0xff] }
 0x1d9   :  { %v941_v22 = vld [vmem:[#allocation7 + $0x5d8] sm:$0xff] }
 0x1da   :  { %2515 = vmatpush1.bf16.msra.mxu0 %v3592_v38  ;;  %v893_v38 = vld [vmem:[#allocation7 + $0x458] sm:$0xff] }
 0x1db   :  { %2597 = vmatpush1.bf16.msra.mxu1 %v3594_v39  ;;  %2516 = vmatprep.subr.bf16.mxu0 %v3601_v40  ;;  %v897_v39 = vld [vmem:[#allocation7 + $0x478] sm:$0xff]  ;;  %v3650_v40 = vcombine.low %v885_v23, %v889_v24 }
 0x1dc   :  { %2598 = vmatprep.subr.bf16.mxu1 %v3603_v41  ;;  %v3657_v41 = vcombine.high %v892_v34, %v896_v35  ;;  %v3659_v44 = vcombine.high %v893_v38, %v897_v39  ;;  %v945_v23 = vld [vmem:[#allocation7 + $0x5f8] sm:$0xff] }
 0x1de   :  { %2517 = vmatpush1.bf16.msra.mxu0 %v3600_v46  ;;  %v905_v46 = vld [vmem:[#allocation7 + $0x4b8] sm:$0xff] }
 0x1df   :  { %2599 = vmatpush1.bf16.msra.mxu1 %v3602_v47  ;;  %2518 = vmatprep.subr.bf16.mxu0 %v3609_v50  ;;  %v3656_v47 = vcombine.low %v892_v34, %v896_v35  ;;  %v3658_v50 = vcombine.low %v893_v38, %v897_v39  ;;  %v3667_v52 = vcombine.high %v901_v45, %v905_v46  ;;  %v952_v34 = vld [vmem:[#allocation7 + $0x630] sm:$0xff]  ;;  %v949_v35 = vld [vmem:[#allocation7 + $0x618] sm:$0xff] }
 0x1e0   :  { %2600 = vmatprep.subr.bf16.mxu1 %v3611_v51  ;;  %v3665_v51 = vcombine.high %v900_v43, %v904_v48  ;;  %v3706_v39 = vcombine.low %v941_v22, %v945_v23 }
 0x1e2   :  { %2519 = vmatpush1.bf16.msra.mxu0 %v3608_v56  ;;  %v913_v56 = vld [vmem:[#allocation7 + $0x4f8] sm:$0xff] }
 0x1e3   :  { %2601 = vmatpush1.bf16.msra.mxu1 %v3610_v57  ;;  %2520 = vmatprep.subr.bf16.mxu0 %v3617_v58  ;;  %v3664_v57 = vcombine.low %v900_v43, %v904_v48  ;;  %v3673_v58 = vcombine.high %v908_v53, %v912_v54  ;;  %v956_v43 = vld [vmem:[#allocation7 + $0x650] sm:$0xff] }
 0x1e4   :  { %2602 = vmatprep.subr.bf16.mxu1 %v3619_v59  ;;  %v3675_v59 = vcombine.high %v909_v55, %v913_v56  ;;  %v960_v48 = vld [vmem:[#allocation7 + $0x670] sm:$0xff] }
 0x1e6   :  { %2521 = vmatpush1.bf16.msra.mxu0 %v3616_v1  ;;  %v3674_v1 = vcombine.low %v909_v55, %v913_v56  ;;  %v969_v55 = vld [vmem:[#allocation7 + $0x6b8] sm:$0xff]  ;;  %v3720_v56 = vcombine.low %v956_v43, %v960_v48 }
 0x1e7   :  { %2603 = vmatpush1.bf16.msra.mxu1 %v3618_v2  ;;  %2522 = vmatprep.subr.bf16.mxu0 %v3625_v32  ;;  %v3681_v2 = vcombine.high %v916_v60, %v920_v61  ;;  %v3683_v32 = vcombine.high %v917_v62, %v921_v63  ;;  %v976_v60 = vld [vmem:[#allocation7 + $0x6f0] sm:$0xff]  ;;  %v973_v61 = vld [vmem:[#allocation7 + $0x6d8] sm:$0xff] }
 0x1e8   :  { %2604 = vmatprep.subr.bf16.mxu1 %v3627_v3  ;;  %v924_v3 = vld [vmem:[#allocation7 + $0x550] sm:$0xff] }
 0x1e9   :  { %v3688_v16 = vcombine.low %v924_v3, %v928_v4 }
 0x1ea   :  { %2523 = vmatpush1.bf16.msra.mxu0 %v3624_v8  ;;  %v3682_v8 = vcombine.low %v917_v62, %v921_v63  ;;  %v977_v62 = vld [vmem:[#allocation7 + $0x6f8] sm:$0xff] }
 0x1eb   :  { %2605 = vmatpush1.bf16.msra.mxu1 %v3626_v9  ;;  %2524 = vmatprep.subr.bf16.mxu0 %v3633_v10  ;;  %v3689_v9 = vcombine.high %v924_v3, %v928_v4  ;;  %v3691_v10 = vcombine.high %v925_v5, %v929_v6  ;;  %v984_v3 = vld [vmem:[#allocation7 + $0x730] sm:$0xff]  ;;  %v981_v4 = vld [vmem:[#allocation7 + $0x718] sm:$0xff] }
 0x1ec   :  { %2606 = vmatprep.subr.bf16.mxu1 %v3635_v11  ;;  %v932_v11 = vld [vmem:[#allocation7 + $0x590] sm:$0xff] }
 0x1ed   :  { %v3696_v24 = vcombine.low %v932_v11, %v936_v12 }
 0x1ee   :  { %2525 = vmatpush1.bf16.msra.mxu0 %v3632_v17  ;;  %v3690_v17 = vcombine.low %v925_v5, %v929_v6  ;;  %v985_v5 = vld [vmem:[#allocation7 + $0x738] sm:$0xff] }
 0x1ef   :  { %2607 = vmatpush1.bf16.msra.mxu1 %v3634_v18  ;;  %2526 = vmatprep.subr.bf16.mxu0 %v3641_v19  ;;  %v3697_v18 = vcombine.high %v932_v11, %v936_v12  ;;  %v3699_v19 = vcombine.high %v933_v13, %v937_v14  ;;  %v992_v11 = vld [vmem:[#allocation7 + $0x770] sm:$0xff]  ;;  %v989_v12 = vld [vmem:[#allocation7 + $0x758] sm:$0xff] }
 0x1f0   :  { %2608 = vmatprep.subr.bf16.mxu1 %v3643_v20  ;;  %v940_v20 = vld [vmem:[#allocation7 + $0x5d0] sm:$0xff] }
 0x1f1   :  { %v3704_v38 = vcombine.low %v940_v20, %v944_v21 }
 0x1f2   :  { %2527 = vmatpush1.bf16.msra.mxu0 %v3640_v25  ;;  %v3698_v25 = vcombine.low %v933_v13, %v937_v14  ;;  %v993_v13 = vld [vmem:[#allocation7 + $0x778] sm:$0xff] }
 0x1f3   :  { %2609 = vmatpush1.bf16.msra.mxu1 %v3642_v26  ;;  %2537 = vmatprep.subr.bf16.mxu0 %v3649_v27  ;;  %v3705_v26 = vcombine.high %v940_v20, %v944_v21  ;;  %v3707_v27 = vcombine.high %v941_v22, %v945_v23  ;;  %v1000_v20 = vld [vmem:[#allocation7 + $0x7b0] sm:$0xff]  ;;  %v997_v21 = vld [vmem:[#allocation7 + $0x798] sm:$0xff] }
 0x1f4   :  { %2619 = vmatprep.subr.bf16.mxu1 %v3651_v28  ;;  %v948_v28 = vld [vmem:[#allocation7 + $0x610] sm:$0xff]  ;;  %v1001_v22 = vld [vmem:[#allocation7 + $0x7b8] sm:$0xff] }
 0x1f5   :  { %2529 = vmatmul.mubr.bf16.vlgmr.msra.gmra.mrb[8].mxu0 %v4468_v49 }
 0x1f6   :  { %2611 = vmatmul.mubr.bf16.vlgmr.msra.gmra.mrb[8].mxu1 %v4468_v49  ;;  %2538 = vmatpush1.bf16.msra.mxu0 %v3648_v36  ;;  %v3666_v49 = vcombine.low %v901_v45, %v905_v46  ;;  %v953_v36 = vld [vmem:[#allocation7 + $0x638] sm:$0xff]  ;;  %v3712_v46 = vcombine.low %v948_v28, %v952_v34 }
 0x1f7   :  { %2569 = vmatprep.mubr.bf16.mxu0 %v4480_v37  ;;  %2620 = vmatpush1.bf16.msra.mxu1 %v3650_v40  ;;  %v3713_v40 = vcombine.high %v948_v28, %v952_v34  ;;  %v961_v45 = vld [vmem:[#allocation7 + $0x678] sm:$0xff]  ;;  %v1008_v28 = vld [vmem:[#allocation7 + $0x7f0] sm:$0xff] }
 0x1f8   :  { %2651 = vmatprep.mubr.bf16.mxu1 %v4480_v37  ;;  %2539 = vmatprep.subr.bf16.mxu0 %v3657_v41  ;;  %v3672_v37 = vcombine.low %v908_v53, %v912_v54  ;;  %v3715_v41 = vcombine.high %v949_v35, %v953_v36  ;;  %v968_v53 = vld [vmem:[#allocation7 + $0x6b0] sm:$0xff]  ;;  %v965_v54 = vld [vmem:[#allocation7 + $0x698] sm:$0xff] }
 0x1f9   :  { %2621 = vmatprep.subr.bf16.mxu1 %v3659_v44  ;;  %v957_v44 = vld [vmem:[#allocation7 + $0x658] sm:$0xff] }
 0x1fa   :  { %2540 = vmatpush1.bf16.msra.mxu0 %v3656_v47  ;;  %v3714_v47 = vcombine.low %v949_v35, %v953_v36  ;;  %v1005_v34 = vld [vmem:[#allocation7 + $0x7d8] sm:$0xff] }
 0x1fb   :  { %2622 = vmatpush1.bf16.msra.mxu1 %v3658_v50  ;;  %2541 = vmatprep.subr.bf16.mxu0 %v3665_v51  ;;  %v3721_v50 = vcombine.high %v956_v43, %v960_v48  ;;  %v3723_v51 = vcombine.high %v957_v44, %v961_v45  ;;  %v1009_v35 = vld [vmem:[#allocation7 + $0x7f8] sm:$0xff]  ;;  %v4089_v48 = vld [vmem:[#allocation8 + $0x40] sm:$0xff]  }
 0x1fc   :  { %2623 = vmatprep.subr.bf16.mxu1 %v3667_v52  ;;  %v964_v52 = vld [vmem:[#allocation7 + $0x690] sm:$0xff]  ;;  %v3770_v43 = vcombine.low %v1005_v34, %v1009_v35 }
 0x1fd   :  { %v3728_v63 = vcombine.low %v964_v52, %v968_v53 }
 0x1fe   :  { %2542 = vmatpush1.bf16.msra.mxu0 %v3664_v57  ;;  %v3722_v57 = vcombine.low %v957_v44, %v961_v45  ;;  %v4090_v44 = vld [vmem:[#allocation8 + $0xc0] sm:$0xff]  }
 0x1ff   :  { %2624 = vmatpush1.bf16.msra.mxu1 %v3666_v49  ;;  %2543 = vmatprep.subr.bf16.mxu0 %v3673_v58  ;;  %v3729_v49 = vcombine.high %v964_v52, %v968_v53  ;;  %v3731_v58 = vcombine.high %v965_v54, %v969_v55  ;;  %v4091_v45 = vld [vmem:[#allocation8] sm:$0xff]   ;;  %v4096_v52 = vld [vmem:[#allocation8 + $0x88] sm:$0xff]   ;;  %v4097_v53 = vld [vmem:[#allocation8 + $0x50] sm:$0xff]  }
 0x200   :  { %2625 = vmatprep.subr.bf16.mxu1 %v3675_v59  ;;  %v972_v59 = vld [vmem:[#allocation7 + $0x6d0] sm:$0xff] }
 0x201   :  { %v3736_v6 = vcombine.low %v972_v59, %v976_v60 }
 0x202   :  { %2544 = vmatpush1.bf16.msra.mxu0 %v3672_v37  ;;  %v3730_v37 = vcombine.low %v965_v54, %v969_v55  ;;  %v4098_v54 = vld [vmem:[#allocation8 + $0xd0] sm:$0xff]  }
 0x203   :  { %2626 = vmatpush1.bf16.msra.mxu1 %v3674_v1  ;;  %2545 = vmatprep.subr.bf16.mxu0 %v3681_v2  ;;  %v3737_v1 = vcombine.high %v972_v59, %v976_v60  ;;  %v3739_v2 = vcombine.high %v973_v61, %v977_v62  ;;  %v4099_v55 = vld [vmem:[#allocation8 + $0x10] sm:$0xff]   ;;  %v4105_v59 = vld [vmem:[#allocation8 + $0x60] sm:$0xff]  }
 0x204   :  { %2627 = vmatprep.subr.bf16.mxu1 %v3683_v32  ;;  %v980_v32 = vld [vmem:[#allocation7 + $0x710] sm:$0xff]  ;;  %v4106_v60 = vld [vmem:[#allocation8 + $0xe0] sm:$0xff]  }
 0x205   :  { %v3744_v14 = vcombine.low %v980_v32, %v984_v3 }
 0x206   :  { %2546 = vmatpush1.bf16.msra.mxu0 %v3680_v7  ;;  %v3738_v7 = vcombine.low %v973_v61, %v977_v62  ;;  %v4107_v61 = vld [vmem:[#allocation8 + $0x20] sm:$0xff]  }
 0x207   :  { %2628 = vmatpush1.bf16.msra.mxu1 %v3682_v8  ;;  %2547 = vmatprep.subr.bf16.mxu0 %v3689_v9  ;;  %v3745_v8 = vcombine.high %v980_v32, %v984_v3  ;;  %v3747_v9 = vcombine.high %v981_v4, %v985_v5  ;;  %v4108_v62 = vld [vmem:[#allocation8 + $0xa0] sm:$0xff]   ;;  %v4113_v32 = vld [vmem:[#allocation8 + $0x70] sm:$0xff]  }
 0x208   :  { %2629 = vmatprep.subr.bf16.mxu1 %v3691_v10  ;;  %v988_v10 = vld [vmem:[#allocation7 + $0x750] sm:$0xff] }
 0x209   :  { %v3752_v23 = vcombine.low %v988_v10, %v992_v11  ;;  %v4114_v3 = vld [vmem:[#allocation8 + $0xf0] sm:$0xff]  }
 0x20a   :  { %2548 = vmatpush1.bf16.msra.mxu0 %v3688_v16  ;;  %v3746_v16 = vcombine.low %v981_v4, %v985_v5  ;;  %v4115_v4 = vld [vmem:[#allocation8 + $0x30] sm:$0xff]  }
 0x20b   :  { %2630 = vmatpush1.bf16.msra.mxu1 %v3690_v17  ;;  %2549 = vmatprep.subr.bf16.mxu0 %v3697_v18  ;;  %v3753_v17 = vcombine.high %v988_v10, %v992_v11  ;;  %v3755_v18 = vcombine.high %v989_v12, %v993_v13  ;;  %v4116_v5 = vld [vmem:[#allocation8 + $0xb0] sm:$0xff]   ;;  %v4121_v10 = vld [vmem:[#allocation8 + $0x140] sm:$0xff]  }
 0x20c   :  { %2631 = vmatprep.subr.bf16.mxu1 %v3699_v19  ;;  %v996_v19 = vld [vmem:[#allocation7 + $0x790] sm:$0xff]  ;;  %v4122_v11 = vld [vmem:[#allocation8 + $0x1c0] sm:$0xff]  }
 0x20d   :  { %v3760_v36 = vcombine.low %v996_v19, %v1000_v20 }
 0x20e   :  { %2550 = vmatpush1.bf16.msra.mxu0 %v3696_v24  ;;  %v3754_v24 = vcombine.low %v989_v12, %v993_v13  ;;  %v4504_v12 = vld [vmem:[%s4576_s4] sm:$0xff] }
 0x20f   :  { %2632 = vmatpush1.bf16.msra.mxu1 %v3698_v25  ;;  %2551 = vmatprep.subr.bf16.mxu0 %v3705_v26  ;;  %v3761_v25 = vcombine.high %v996_v19, %v1000_v20  ;;  %v3763_v26 = vcombine.high %v997_v21, %v1001_v22  ;;  %v1015_v13 = vrot.slane %v4504_v12, %v171_v31 }
 0x210   :  { %2633 = vmatprep.subr.bf16.mxu1 %v3707_v27  ;;  %v1004_v27 = vld [vmem:[#allocation7 + $0x7d0] sm:$0xff] }
 0x212   :  { %2552 = vmatpush1.bf16.msra.mxu0 %v3704_v38  ;;  %v3762_v38 = vcombine.low %v997_v21, %v1001_v22 }
 0x213   :  { %2634 = vmatpush1.bf16.msra.mxu1 %v3706_v39  ;;  %2553 = vmatprep.subr.bf16.mxu0 %v3713_v40  ;;  %v3769_v39 = vcombine.high %v1004_v27, %v1008_v28  ;;  %v3771_v40 = vcombine.high %v1005_v34, %v1009_v35 }
 0x214   :  { %2635 = vmatprep.subr.bf16.mxu1 %v3715_v41  ;;  %v3768_v41 = vcombine.low %v1004_v27, %v1008_v28 }
 0x216   :  { %2554 = vmatpush1.bf16.msra.mxu0 %v3712_v46  ;;  %v4092_v46 = vld [vmem:[#allocation8 + $0x80] sm:$0xff]  }
 0x217   :  { %2636 = vmatpush1.bf16.msra.mxu1 %v3714_v47  ;;  %2555 = vmatprep.subr.bf16.mxu0 %v3721_v50  ;;  %v4093_v47 = vld [vmem:[#allocation8 + $0x48] sm:$0xff]  }
 0x218   :  { %2637 = vmatprep.subr.bf16.mxu1 %v3723_v51  ;;  %v4094_v50 = vld [vmem:[#allocation8 + $0xc8] sm:$0xff]  }
 0x219   :  { %v4095_v51 = vld [vmem:[#allocation8 + $0x8] sm:$0xff]  }
 0x21a   :  { %2556 = vmatpush1.bf16.msra.mxu0 %v3720_v56  ;;  %v4100_v56 = vld [vmem:[#allocation8 + $0x90] sm:$0xff]  }
 0x21b   :  { %2638 = vmatpush1.bf16.msra.mxu1 %v3722_v57  ;;  %2557 = vmatprep.subr.bf16.mxu0 %v3729_v49  ;;  %v4101_v57 = vld [vmem:[#allocation8 + $0x58] sm:$0xff]  }
 0x21c   :  { %2639 = vmatprep.subr.bf16.mxu1 %v3731_v58  ;;  %v4102_v49 = vld [vmem:[#allocation8 + $0xd8] sm:$0xff]  }
 0x21d   :  { %v4103_v58 = vld [vmem:[#allocation8 + $0x18] sm:$0xff]  }
 0x21e   :  { %2558 = vmatpush1.bf16.msra.mxu0 %v3728_v63  ;;  %v4109_v63 = vld [vmem:[#allocation8 + $0x68] sm:$0xff]  }
 0x21f   :  { %2640 = vmatpush1.bf16.msra.mxu1 %v3730_v37  ;;  %2559 = vmatprep.subr.bf16.mxu0 %v3737_v1  ;;  %v4110_v37 = vld [vmem:[#allocation8 + $0xe8] sm:$0xff]  }
 0x220   :  { %2641 = vmatprep.subr.bf16.mxu1 %v3739_v2  ;;  %v4111_v1 = vld [vmem:[#allocation8 + $0x28] sm:$0xff]  }
 0x221   :  { %v4112_v2 = vld [vmem:[#allocation8 + $0xa8] sm:$0xff]  }
 0x222   :  { %2560 = vmatpush1.bf16.msra.mxu0 %v3736_v6  ;;  %v4117_v6 = vld [vmem:[#allocation8 + $0x78] sm:$0xff]  }
 0x223   :  { %2642 = vmatpush1.bf16.msra.mxu1 %v3738_v7  ;;  %2561 = vmatprep.subr.bf16.mxu0 %v3745_v8  ;;  %v4118_v7 = vld [vmem:[#allocation8 + $0xf8] sm:$0xff]  }
 0x224   :  { %2643 = vmatprep.subr.bf16.mxu1 %v3747_v9  ;;  %v4119_v8 = vld [vmem:[#allocation8 + $0x38] sm:$0xff]  }
 0x225   :  { %v4120_v9 = vld [vmem:[#allocation8 + $0xb8] sm:$0xff]  }
 0x226   :  { %2562 = vmatpush1.bf16.msra.mxu0 %v3744_v14  ;;  %v1023_v14 = vrot.slane %v4504_v12, %v179_v42 }
 0x227   :  { %2644 = vmatpush1.bf16.msra.mxu1 %v3746_v16  ;;  %2563 = vmatprep.subr.bf16.mxu0 %v3753_v17  ;;  %v1019_v16 = vrot.slane %v4504_v12, %v175_v33  ;;  %v1027_v17 = vrot.slane %v4504_v12, %v183_v0  ;;  %v4124_v0 = vld [vmem:[#allocation8 + $0x180] sm:$0xff]  }
 0x228   :  { %2645 = vmatprep.subr.bf16.mxu1 %v3755_v18 }
 0x22a   :  { %2564 = vmatpush1.bf16.msra.mxu0 %v3752_v23 }
 0x22b   :  { %2646 = vmatpush1.bf16.msra.mxu1 %v3754_v24  ;;  %2565 = vmatprep.subr.bf16.mxu0 %v3761_v25 }
 0x22c   :  { %2647 = vmatprep.subr.bf16.mxu1 %v3763_v26 }
 0x22e   :  { %2566 = vmatpush1.bf16.msra.mxu0 %v3760_v36 }
 0x22f   :  { %2648 = vmatpush1.bf16.msra.mxu1 %v3762_v38  ;;  %2567 = vmatprep.subr.bf16.mxu0 %v3769_v39  ;;  %v4123_v39 = vld [vmem:[#allocation8 + $0x100] sm:$0xff]  }
 0x230   :  { %2649 = vmatprep.subr.bf16.mxu1 %v3771_v40 }
 0x232   :  { %2568 = vmatpush1.bf16.msra.mxu0 %v3768_v41 }
 0x233   :  { %2650 = vmatpush1.bf16.msra.mxu1 %v3770_v43  ;;  %3837 = vmatprep.subr.bf16.mxu0 %v4089_v48  ;;  %v4125_v43 = vld [vmem:[#allocation8 + $0x148] sm:$0xff]  }
 0x234   :  { %3859 = vmatprep.subr.bf16.mxu1 %v4090_v44  ;;  %v4126_v48 = vld [vmem:[#allocation8 + $0x1c8] sm:$0xff]  }
 0x235   :  { %2570 = vmatmul.mubr.bf16.vlgmr.msra.gmra.mrb[8].mxu0 %v4489_v15  ;;  %v4127_v44 = vld [vmem:[#allocation8 + $0x108] sm:$0xff]  }
 0x236   :  { %2652 = vmatmul.mubr.bf16.vlgmr.msra.gmra.mrb[8].mxu1 %v4489_v15  ;;  %3838 = vmatpush3.bf16.msra.mxu0 %v4091_v45  ;;  %v4104_v15 = vld [vmem:[#allocation8 + $0x98] sm:$0xff]   ;;  %v4128_v45 = vld [vmem:[#allocation8 + $0x188] sm:$0xff]  }
 0x237   :  { %3860 = vmatpush3.bf16.msra.mxu1 %v4092_v46  ;;  %3839 = vmatprep.subr.bf16.mxu0 %v4093_v47  ;;  %v4129_v46 = vld [vmem:[#allocation8 + $0x150] sm:$0xff]  }
 0x238   :  { %3861 = vmatprep.subr.bf16.mxu1 %v4094_v50  ;;  %v4130_v47 = vld [vmem:[#allocation8 + $0x1d0] sm:$0xff]  }
 0x239   :  { %v4131_v50 = vld [vmem:[#allocation8 + $0x110] sm:$0xff]  }
 0x23a   :  { %3840 = vmatpush3.bf16.msra.mxu0 %v4095_v51  ;;  %v4132_v51 = vld [vmem:[#allocation8 + $0x190] sm:$0xff]  }
 0x23b   :  { %3862 = vmatpush3.bf16.msra.mxu1 %v4096_v52  ;;  %3841 = vmatprep.subr.bf16.mxu0 %v4097_v53  ;;  %v4133_v52 = vld [vmem:[#allocation8 + $0x158] sm:$0xff]  }
 0x23c   :  { %3863 = vmatprep.subr.bf16.mxu1 %v4098_v54  ;;  %v4134_v53 = vld [vmem:[#allocation8 + $0x1d8] sm:$0xff]  }
 0x23d   :  { %v4135_v54 = vld [vmem:[#allocation8 + $0x118] sm:$0xff]  }
 0x23e   :  { %3842 = vmatpush3.bf16.msra.mxu0 %v4099_v55  ;;  %v4136_v55 = vld [vmem:[#allocation8 + $0x198] sm:$0xff]  }
 0x23f   :  { %3864 = vmatpush3.bf16.msra.mxu1 %v4100_v56  ;;  %3843 = vmatprep.subr.bf16.mxu0 %v4101_v57  ;;  %v4137_v56 = vld [vmem:[#allocation8 + $0x160] sm:$0xff]  }
 0x240   :  { %3865 = vmatprep.subr.bf16.mxu1 %v4102_v49  ;;  %v4138_v57 = vld [vmem:[#allocation8 + $0x1e0] sm:$0xff]  }
 0x241   :  { %v4139_v49 = vld [vmem:[#allocation8 + $0x120] sm:$0xff]  }
 0x242   :  { %3844 = vmatpush3.bf16.msra.mxu0 %v4103_v58  ;;  %v4140_v58 = vld [vmem:[#allocation8 + $0x1a0] sm:$0xff]  }
 0x243   :  { %3866 = vmatpush3.bf16.msra.mxu1 %v4104_v15  ;;  %3845 = vmatprep.subr.bf16.mxu0 %v4105_v59  ;;  %v4141_v15 = vld [vmem:[#allocation8 + $0x168] sm:$0xff]  }
 0x244   :  { %3867 = vmatprep.subr.bf16.mxu1 %v4106_v60  ;;  %v4142_v59 = vld [vmem:[#allocation8 + $0x1e8] sm:$0xff]  }
 0x245   :  { %v4143_v60 = vld [vmem:[#allocation8 + $0x128] sm:$0xff]  }
 0x246   :  { %3846 = vmatpush3.bf16.msra.mxu0 %v4107_v61  ;;  %v4144_v61 = vld [vmem:[#allocation8 + $0x1a8] sm:$0xff]  }
 0x247   :  { %3868 = vmatpush3.bf16.msra.mxu1 %v4108_v62  ;;  %3847 = vmatprep.subr.bf16.mxu0 %v4109_v63  ;;  %v4145_v62 = vld [vmem:[#allocation8 + $0x170] sm:$0xff]  }
 0x248   :  { %3869 = vmatprep.subr.bf16.mxu1 %v4110_v37  ;;  %v4146_v63 = vld [vmem:[#allocation8 + $0x1f0] sm:$0xff]  }
 0x249   :  { %v4147_v37 = vld [vmem:[#allocation8 + $0x130] sm:$0xff]  }
 0x24a   :  { %3848 = vmatpush3.bf16.msra.mxu0 %v4111_v1  ;;  %v4148_v1 = vld [vmem:[#allocation8 + $0x1b0] sm:$0xff]  }
 0x24b   :  { %3870 = vmatpush3.bf16.msra.mxu1 %v4112_v2  ;;  %3849 = vmatprep.subr.bf16.mxu0 %v4113_v32  ;;  %v4149_v2 = vld [vmem:[#allocation8 + $0x178] sm:$0xff]  }
 0x24c   :  { %3871 = vmatprep.subr.bf16.mxu1 %v4114_v3  ;;  %v4150_v32 = vld [vmem:[#allocation8 + $0x1f8] sm:$0xff]  }
 0x24d   :  { %v4151_v3 = vld [vmem:[#allocation8 + $0x138] sm:$0xff]  }
 0x24e   :  { %3850 = vmatpush3.bf16.msra.mxu0 %v4115_v4  ;;  %v4152_v4 = vld [vmem:[#allocation8 + $0x1b8] sm:$0xff]  }
 0x24f   :  { %3872 = vmatpush3.bf16.msra.mxu1 %v4116_v5  ;;  %3851 = vmatprep.subr.bf16.mxu0 %v4117_v6  ;;  %v1030_v5 = vsub.s32 4, %v4451_v30  ;;  %v1038_v6 = vsub.s32 6, %v4451_v30 }
 0x250   :  { %3873 = vmatprep.subr.bf16.mxu1 %v4118_v7  ;;  %v1034_v7 = vsub.s32 5, %v4451_v30 }
 0x252   :  { %3852 = vmatpush3.bf16.msra.mxu0 %v4119_v8  ;;  %v1042_v8 = vsub.s32 7, %v4451_v30 }
 0x253   :  { %3874 = vmatpush3.bf16.msra.mxu1 %v4120_v9  ;;  %3881 = vmatprep.subr.bf16.mxu0 %v4121_v10  ;;  %v1031_v9 = vrot.slane %v4504_v12, %v1030_v5  ;;  %v1039_v10 = vrot.slane %v4504_v12, %v1038_v6 }
 0x254   :  { %3903 = vmatprep.subr.bf16.mxu1 %v4122_v11  ;;  %v1035_v11 = vrot.slane %v4504_v12, %v1034_v7 }
 0x288   :  { %v2407_v18 = vpop.f32.mrb[4].mxu0  ;;  %v2489_v19 = vpop.f32.mrb[4].mxu1 }
 0x289   :  { %v3929_v20 = vadd.f32 %v2407_v18, %v1015_v13  ;;  %v3931_v21 = vadd.f32 %v2489_v19, %v1023_v14  ;;  %v2409_v22 = vpop.f32.mrb[5].mxu0  ;;  %v2491_v23 = vpop.f32.mrb[5].mxu1  ;;  %v1043_v13 = vrot.slane %v4504_v12, %v1042_v8 }
 0x28a   :  { %v3930_v24 = vadd.f32 %v2409_v22, %v1019_v16  ;;  %v3932_v31 = vadd.f32 %v2491_v23, %v1027_v17  ;;  %v2411_v25 = vpop.f32.mrb[6].mxu0  ;;  %v2493_v26 = vpop.f32.mrb[6].mxu1 }
 0x28b   :  { %v2660_v27 = vmax.f32 %v3929_v20, 0.0  ;;  %v2662_v42 = vmax.f32 %v3931_v21, 0.0  ;;  %v2412_v28 = vpop.f32.mrb[7].mxu0  ;;  %v2494_v34 = vpop.f32.mrb[7].mxu1 }
 0x28c   :  { %v2661_v35 = vmax.f32 %v3930_v24, 0.0  ;;  %v2663_v33 = vmax.f32 %v3932_v31, 0.0 }
 0x28d   :  { %v2668_v40 = vpack.c.bf16 %v2660_v27, %v2660_v27  ;;  %v2670_v41 = vpack.c.bf16 %v2662_v42, %v2662_v42 }
 0x28e   :  { %v2669_v36 = vpack.c.bf16 %v2661_v35, %v2661_v35  ;;  %v2671_v38 = vpack.c.bf16 %v2663_v33, %v2663_v33 }
 0x290   :  { %3227 = vmatprep.mubr.bf16.mxu0 %v2669_v36  ;;  %3267 = vmatprep.mubr.bf16.mxu1 %v2671_v38 }
 0x291   :  { %3228 = vmatmul.mubr.bf16.vlgmr.msra.gmra.mrb[12].mxu0 %v2668_v40  ;;  %3268 = vmatmul.mubr.bf16.vlgmr.msra.gmra.mrb[12].mxu1 %v2670_v41 }
 0x292   :  { %3882 = vmatpush3.bf16.msra.mxu0 %v4123_v39  ;;  %3904 = vmatpush3.bf16.msra.mxu1 %v4124_v0  ;;  %v3772_v39 = vld [vmem:[%s4578_s6] ss:$0 sm:$0xff]  ;;  %s4332_s6 = smov [#allocation11]  }
 0x293   :  { %3883 = vmatprep.subr.bf16.mxu0 %v4125_v43  ;;  %3905 = vmatprep.subr.bf16.mxu1 %v4126_v48  ;;  %s3408_s20 = sshll.u32 %s4332_s6, 4  ;;  %s3409_s20 = int_to_ptr.vmem [resolvable:$true] %s3408_s20 }
 0x294   :  { %s4245_s0 = scalar_lea.vmem %s3409_s20, 128  ;;  %p4250_p5 = scmp.lt.s32.totalorder %s3409_s20, %s3409_s20 }
 0x295   :  { %p4246_p4 = scmp.ne.s32.totalorder %s3409_s20, %s4245_s0  ;;  %p4251_p6 = scmp.lt.s32.totalorder %s4245_s0, %s4245_s0 }
 0x296   :  { %3884 = vmatpush3.bf16.msra.mxu0 %v4127_v44  ;;  %3906 = vmatpush3.bf16.msra.mxu1 %v4128_v45 }
 0x297   :  { %3885 = vmatprep.subr.bf16.mxu0 %v4129_v46  ;;  %3907 = vmatprep.subr.bf16.mxu1 %v4130_v47  ;;  %p4252_p7 = por %p4251_p6, %p4250_p5 }
 0x299   :  { %p4253_p8 = pnand %p4252_p7, %p4246_p4 }
 0x29a   :  { %3886 = vmatpush3.bf16.msra.mxu0 %v4131_v50  ;;  %3908 = vmatpush3.bf16.msra.mxu1 %v4132_v51 }
 0x29b   :  { %3887 = vmatprep.subr.bf16.mxu0 %v4133_v52  ;;  %3909 = vmatprep.subr.bf16.mxu1 %v4134_v53 }
 0x29e   :  { %3888 = vmatpush3.bf16.msra.mxu0 %v4135_v54  ;;  %3910 = vmatpush3.bf16.msra.mxu1 %v4136_v55  ;;  %v4530_v54 = vand.u32 127, %v169_v29 }
 0x29f   :  { %3889 = vmatprep.subr.bf16.mxu0 %v4137_v56  ;;  %3911 = vmatprep.subr.bf16.mxu1 %v4138_v57 }
 0x2a0   :  { %vm3358_vm2 = vcmp.lt.s32.totalorder %v4530_v54, 10 }
 0x2a2   :  { %3890 = vmatpush3.bf16.msra.mxu0 %v4139_v49  ;;  %3912 = vmatpush3.bf16.msra.mxu1 %v4140_v58 }
 0x2a3   :  { %3891 = vmatprep.subr.bf16.mxu0 %v4141_v15  ;;  %3913 = vmatprep.subr.bf16.mxu1 %v4142_v59 }
 0x2a6   :  { %3892 = vmatpush3.bf16.msra.mxu0 %v4143_v60  ;;  %3914 = vmatpush3.bf16.msra.mxu1 %v4144_v61 }
 0x2a7   :  { %3893 = vmatprep.subr.bf16.mxu0 %v4145_v62  ;;  %3915 = vmatprep.subr.bf16.mxu1 %v4146_v63 }
 0x2aa   :  { %3894 = vmatpush3.bf16.msra.mxu0 %v4147_v37  ;;  %3916 = vmatpush3.bf16.msra.mxu1 %v4148_v1 }
 0x2ab   :  { %3895 = vmatprep.subr.bf16.mxu0 %v4149_v2  ;;  %3917 = vmatprep.subr.bf16.mxu1 %v4150_v32 }
 0x2ae   :  { %3896 = vmatpush3.bf16.msra.mxu0 %v4151_v3  ;;  %3918 = vmatpush3.bf16.msra.mxu1 %v4152_v4 }
 0x308   :  { %v2571_v14 = vpop.f32.mrb[8].mxu0 }
 0x309   :  { %v3933_v16 = vadd.f32 %v2571_v14, %v1031_v9  ;;  %v2653_v17 = vpop.f32.mrb[8].mxu1  ;;  %v2573_v18 = vpop.f32.mrb[9].mxu0 }
 0x30a   :  { %v3935_v19 = vadd.f32 %v2653_v17, %v1039_v10  ;;  %v3934_v20 = vadd.f32 %v2573_v18, %v1035_v11  ;;  %v2655_v21 = vpop.f32.mrb[9].mxu1  ;;  %v2575_v22 = vpop.f32.mrb[10].mxu0 }
 0x30b   :  { %v2664_v23 = vmax.f32 %v3933_v16, 0.0  ;;  %v3936_v24 = vadd.f32 %v2655_v21, %v1043_v13  ;;  %v2657_v31 = vpop.f32.mrb[10].mxu1  ;;  %v2576_v25 = vpop.f32.mrb[11].mxu0 }
 0x30c   :  { %v2666_v26 = vmax.f32 %v3935_v19, 0.0  ;;  %v2665_v27 = vmax.f32 %v3934_v20, 0.0  ;;  %v2658_v42 = vpop.f32.mrb[11].mxu1 }
 0x30d   :  { %v2667_v28 = vmax.f32 %v3936_v24, 0.0  ;;  %v2672_v35 = vpack.c.bf16 %v2664_v23, %v2664_v23 }
 0x30e   :  { %v2673_v34 = vpack.c.bf16 %v2665_v27, %v2665_v27  ;;  %v2674_v12 = vpack.c.bf16 %v2666_v26, %v2666_v26 }
 0x30f   :  { %v2675_v33 = vpack.c.bf16 %v2667_v28, %v2667_v28 }
 0x310   :  { %3307 = vmatprep.mubr.bf16.mxu0 %v2673_v34 }
 0x311   :  { %3347 = vmatprep.mubr.bf16.mxu1 %v2675_v33  ;;  %3308 = vmatmul.mubr.bf16.vlgmr.msra.gmra.mrb[16].mxu0 %v2672_v35 }
 0x312   :  { %3348 = vmatmul.mubr.bf16.vlgmr.msra.gmra.mrb[16].mxu1 %v2674_v12 }
 0x364   :  { %v3853_v36 = vpop.f32.mrb[12].mxu0  ;;  %v3875_v38 = vpop.f32.mrb[12].mxu1 }
 0x365   :  { %v3854_v0 = vpop.f32.mrb[13].mxu0  ;;  %v3876_v40 = vpop.f32.mrb[13].mxu1 }
 0x366   :  { %v3855_v41 = vadd.f32 %v3854_v0, %v3853_v36  ;;  %v3877_v43 = vadd.f32 %v3876_v40, %v3875_v38  ;;  %v3856_v48 = vpop.f32.mrb[14].mxu0  ;;  %v3878_v44 = vpop.f32.mrb[14].mxu1 }
 0x367   :  { %v3857_v45 = vpop.f32.mrb[15].mxu0  ;;  %v3879_v46 = vpop.f32.mrb[15].mxu1 }
 0x368   :  { %v3230_v47 = vadd.f32 %v3855_v41, %v3772_v39 }
 0x36a   :  { %v3270_v50 = vadd.f32 %v3877_v43, %v3230_v47 }
 0x3e4   :  { %v3897_v51 = vpop.f32.mrb[16].mxu0 }
 0x3e5   :  { %v3919_v52 = vpop.f32.mrb[16].mxu1  ;;  %v3898_v53 = vpop.f32.mrb[17].mxu0 }
 0x3e6   :  { %v3899_v55 = vadd.f32 %v3898_v53, %v3897_v51  ;;  %v3920_v56 = vpop.f32.mrb[17].mxu1  ;;  %v3900_v57 = vpop.f32.mrb[18].mxu0 }
 0x3e7   :  { %v3921_v49 = vadd.f32 %v3920_v56, %v3919_v52  ;;  %v3922_v58 = vpop.f32.mrb[18].mxu1  ;;  %v3901_v15 = vpop.f32.mrb[19].mxu0 }
 0x3e8   :  { %v3310_v59 = vadd.f32 %v3899_v55, %v3270_v50  ;;  %v3923_v60 = vpop.f32.mrb[19].mxu1 }
 0x3ea   :  { %v3350_v61 = vadd.f32 %v3921_v49, %v3310_v59 }
 0x3ec   :  { %3355 = vst [vmem:[#allocation10] sm:$0xff] %v3350_v61  ;;  %v3359_v62 = vsel %vm3358_vm2, %v3350_v61, -1e+30 }
 0x3ed   :  { %3360 = vmax.xlane.f32.xlu0 %v3359_v62 }
 0x47a   :  { %v3361_v63 = vpop.xlane.xlu0 %3360 }
 0x47b   :  { %v3362_v37 = vsub.f32 %v3359_v62, %v3361_v63  ;;  %vm3370_vm3 = vcmp.eq.f32.partialorder %v3359_v62, %v3361_v63 }
 0x47c   :  { %v3371_v29 = vsel %vm3370_vm3, %v4530_v54, 2147483647 }
 0x47d   :  { %v3363_v1 = vmul.f32 1.442695, %v3362_v37  ;;  %v3373_v2 = vshra.s32 %v3371_v29, 16  ;;  %v3372_v4 = vand.u32 65535, %v3371_v29 }
 0x47f   :  { %4153 = vpow2.f32 %v3363_v1  ;;  %v3375_v32 = vcvt.s32.f32 %v3373_v2  ;;  %v3374_v6 = vcvt.s32.f32 %v3372_v4 }
 0x481   :  { %3376 = vmin.xlane.f32.xlu0 %v3375_v32 }
 0x489   :  { %v4154_v3 = vpop.eup %4153 }
 0x48a   :  { %3365 = vadd.xlane.f32.xlu1 %v4154_v3 }
 0x50e   :  { %v3377_v5 = vpop.xlane.xlu0 %3376 }
 0x50f   :  { %vm3378_vm4 = vcmp.eq.f32.partialorder %v3375_v32, %v3377_v5 }
 0x510   :  { %v3379_v7 = vsel %vm3378_vm4, %v3374_v6, inf }
 0x511   :  { %3380 = vmin.xlane.f32.xlu1 %v3379_v7 }
 0x517   :  { %v3366_v8 = vpop.xlane.xlu1 %3365 }
 0x518   :  { %4155 = vrcp.f32 %v3366_v8 }
 0x522   :  { %v4156_v9 = vpop.eup %4155 }
 0x523   :  { %v3368_v10 = vmul.f32 %v4156_v9, %v4154_v3 }
 0x525   :  { %3369 = vst [vmem:[#allocation11] sm:$0xff] %v3368_v10 }
 0x526   :  { %4256 = shalt.err (!%p4253_p8)
}
 0x527   :  { %s4257_s25 = scalar_lea.hbm %s4580_s8, 128 }
 0x528   :  { %p4258_p9 = scmp.ne.s32.totalorder %s4580_s8, %s4257_s25  ;;  %p4261_p10 = scmp.lt.u32.totalorder %s4257_s25, %s4580_s8 }
 0x52a   :  { %p4263_p11 = pnand %p4261_p10, %p4258_p9 }
 0x52c   :  { %4266 = shalt.err (!%p4263_p11)
}
 0x52d   :  { %3411 = dma.vmem_to_hbm [thread:$0]  %s3409_s20, 128, %s4580_s8, [#allocation12]  }
 0x52e   :  { %s4267_s13 = scalar_lea.vmem %s3399_s22, 128  ;;  %p4272_p13 = scmp.lt.s32.totalorder %s3399_s22, %s3399_s22 }
 0x52f   :  { %p4268_p12 = scmp.ne.s32.totalorder %s3399_s22, %s4267_s13  ;;  %p4273_p0 = scmp.lt.s32.totalorder %s4267_s13, %s4267_s13 }
 0x531   :  { %p4274_p1 = por %p4273_p0, %p4272_p13 }
 0x533   :  { %p4275_p2 = pnand %p4274_p1, %p4268_p12 }
 0x535   :  { %4278 = shalt.err (!%p4275_p2)
}
 0x536   :  { %s4279_s14 = scalar_lea.hbm %s4579_s7, 128 }
 0x537   :  { %p4280_p3 = scmp.ne.s32.totalorder %s4579_s7, %s4279_s14  ;;  %p4283_p4 = scmp.lt.u32.totalorder %s4279_s14, %s4579_s7 }
 0x539   :  { %p4285_p5 = pnand %p4283_p4, %p4280_p3 }
 0x53b   :  { %4288 = shalt.err (!%p4285_p5)
}
 0x53c   :  { %3401 = dma.vmem_to_hbm [thread:$0]  %s3399_s22, 128, %s4579_s7, [#allocation4]   ;;  %v3383_v11 = vcvt.f32.s32 %v3377_v5  ;;  %v3388_v16 = vsub.s32 %v4530_v54, %v4451_v30  ;;  %vm3390_vm5 = vcmask 57344  }
 0x53d   :  { %s4334_s17 = smov [#allocation13]  }
 0x53e   :  { %v3384_v14 = vshll.u32 %v3383_v11, 16  ;;  %s3418_s2 = sshll.u32 %s4334_s17, 4  ;;  %s3419_s2 = int_to_ptr.vmem [resolvable:$true] %s3418_s2 }
 0x53f   :  { %s4289_s18 = scalar_lea.vmem %s3419_s2, 16  ;;  %s4293_s4 = scalar_lea.vmem %s3419_s2, 32 }
 0x540   :  { %p4290_p6 = scmp.ne.s32.totalorder %s3419_s2, %s4289_s18  ;;  %p4294_p7 = scmp.lt.s32.totalorder %s3419_s2, %s3419_s2 }
 0x541   :  { %p4295_p8 = scmp.lt.s32.totalorder %s4293_s4, %s4289_s18 }
 0x543   :  { %p4296_p9 = por %p4295_p8, %p4294_p7 }
 0x545   :  { %p4297_p10 = pnand %p4296_p9, %p4290_p6 }
 0x59e   :  { %v3381_v13 = vpop.xlane.xlu1 %3380 }
 0x59f   :  { %v3382_v17 = vcvt.f32.s32 %v3381_v13 }
 0x5a1   :  { %v3385_v18 = vadd.s32 %v3384_v14, %v3382_v17 }
 0x5a3   :  { %v3389_v19 = vrot.slane %v3385_v18, %v3388_v16 }
 0x5a5   :  { %3391 = vst.msk [vmem:[#allocation13] sm:$0x1] %vm3390_vm5, %v3389_v19 }
 0x5a6   :  { %4300 = shalt.err (!%p4297_p10)
}
 0x5a7   :  { %s4301_s6 = scalar_lea.hbm %s4581_s9, 16 }
 0x5a8   :  { %p4302_p11 = scmp.ne.s32.totalorder %s4581_s9, %s4301_s6  ;;  %p4305_p12 = scmp.lt.u32.totalorder %s4301_s6, %s4581_s9 }
 0x5aa   :  { %p4307_p13 = pnand %p4305_p12, %p4302_p11 }
 0x5ac   :  { %4310 = shalt.err (!%p4307_p13)
}
 0x5ad   :  { %3421 = dma.vmem_to_hbm [thread:$0]  %s3419_s2, 16, %s4581_s9, [#allocation12]  }
 0x5ae   :  { %4317 = dma.done.wait [#allocation4], 128  }
 0x5af   :  { %4318 = vsyncadd [#allocation4], 4294967168 }
 0x5b0   :  { %4319 = dma.done.wait [#allocation12], 144  }
 0x5b1   :  { %4320 = vsyncadd [#allocation12], 4294967152 }
 0x5b2   :  { %3431 = vsyncpa [#allocation3], 1 }
 0x5b3   :  { %3432 = vsyncpa [#allocation6], 1 }
 0x5b4   :  { %3433 = vsyncpa [#allocation9], 1 }
 0x5b5   :  { %3434 = vsyncpa [#allocation4], 1 }
 0x5b6   :  { %3435 = vsyncpa [#allocation12], 1 }

</bundles_post_ra>
